<compile_context>
chip_gen: v7x
topology: tpu7x:2x2x1
jax: 0.10.0
libtpu: 0.0.40
codegen_flags: <defaults>
</compile_context>

<pallas_src>
import math
import functools

import jax
import jax.numpy as jnp
from jax.experimental import pallas as pl
from jax.experimental.pallas import tpu as pltpu

BN_EPS = 1e-5


def _vmem_limit_bytes():
    # 75% of physical VMEM: 96 MiB on v5e/v6e (128 MiB), 48 MiB on v7x (64 MiB).
    try:
        cap = pltpu.get_tpu_info().vmem_capacity_bytes
    except Exception:
        cap = 128 * 1024 * 1024
    return int(cap * 3 // 4)


VMEM_LIMIT = _vmem_limit_bytes()
# Larger row tiles where VMEM allows (v5e/v6e), 512 on v7x.
ROW_TILE_TARGET = 1024 if VMEM_LIMIT >= 72 * 1024 * 1024 else 512


def _make_divisible(v, divisor, min_value=None):
    if min_value is None:
        min_value = divisor
    new_v = max(min_value, int(v + divisor / 2) // divisor * divisor)
    if new_v < 0.9 * v:
        new_v += divisor
    return new_v


def _row_tile(m, target):
    """Largest row (sublane) tile <= target dividing m, preferring multiples
    of 16 (bf16 sublane packing), then 8, else m itself (full extent)."""
    if m <= target:
        return m
    for align in (16, 8):
        t = (target // align) * align
        while t >= align:
            if m % t == 0:
                return t
            t -= align
    return m


def _lane_tile(n, target=256):
    """Lane (last-dim) tile: a multiple of 128 dividing n, else the full dim."""
    if n % 128 == 0 and n > target:
        t = (target // 128) * 128
        while t >= 128:
            if n % t == 0:
                return t
            t -= 128
    return n


# ----------------------------- Pallas kernels -----------------------------

def _mm_kernel(*refs, nk, act, has_gate, has_res, has_out, has_pool,
               rpb_tiles, inv_rpb):
    """Tiled (M,K)@(K,N) with fused BN bias + activation, optional per-image
    SE gate on the LHS, optional residual add, optional per-image global
    average pool as a second output.  An f32 VMEM accumulator is used only
    when K is tiled (nk > 1)."""
    it = iter(refs)
    x_ref = next(it)
    gate_ref = next(it) if has_gate else None
    w_ref = next(it)
    b_ref = next(it)
    res_ref = next(it) if has_res else None
    o_ref = next(it) if has_out else None
    pool_ref = next(it) if has_pool else None
    acc_ref = next(it) if nk > 1 else None

    i = pl.program_id(1)
    k = pl.program_id(2)

    xv = x_ref[...]
    if has_gate:
        xv = (xv.astype(jnp.float32) * gate_ref[0]).astype(jnp.bfloat16)
    part = jnp.dot(xv, w_ref[...], preferred_element_type=jnp.float32)

    if nk > 1:
        @pl.when(k == 0)
        def _():
            acc_ref[...] = part

        @pl.when(k > 0)
        def _():
            acc_ref[...] += part

    @pl.when(k == nk - 1)
    def _epilogue():
        acc = acc_ref[...] if nk > 1 else part
        out = acc + b_ref[...]
        if act == "silu":
            out = out * jax.nn.sigmoid(out)
        if has_res:
            out = out + res_ref[...].astype(jnp.float32)
        if has_out:
            o_ref[...] = out.astype(o_ref.dtype)
        if has_pool:
            s = (jnp.sum(out, axis=0) * inv_rpb).reshape(1, 1, -1)
            first = (i % rpb_tiles) == 0
            prev = jnp.where(first, jnp.zeros_like(s), pool_ref[...])
            pool_ref[...] = prev + s


def _dw_kernel(x_ref, w_ref, b_ref, *out_refs, pool, inv_hw):
    """Depthwise 3x3 (stride 1) + BN + SiLU over one padded image and one
    channel tile, read directly from the padded activation (no tap copies).
    Optionally also emits the per-image channel mean (fused SE squeeze)."""
    o_ref = out_refs[0]
    pool_ref = out_refs[1] if pool else None
    x = x_ref[0].astype(jnp.float32)            # (Hp, Wp, TC)
    hp, wp, tc = x.shape
    ho, wo = hp - 2, wp - 2
    w = w_ref[...]                              # (9, TC) f32
    acc = jnp.zeros((ho, wo, tc), jnp.float32)
    for ky in range(3):
        for kx in range(3):
            acc = acc + x[ky:ky + ho, kx:kx + wo, :] * w[ky * 3 + kx]
    acc = acc + b_ref[0]
    # SiLU with the divide on the EUP (separate VLIW slot from the VALU).
    out = acc * pl.reciprocal(1.0 + jnp.exp(-acc), approx=True)
    o_ref[0] = out.astype(o_ref.dtype)
    if pool:
        pool_ref[...] = (jnp.sum(out, axis=(0, 1)) * inv_hw).reshape(1, 1, -1)


def _mean_kernel(x_ref, o_ref, *, inv_hw):
    s = jnp.sum(x_ref[0].astype(jnp.float32), axis=(0, 1))
    o_ref[...] = (s * inv_hw).reshape(1, 1, -1)


def _se_fc_kernel(m_ref, w1_ref, b1_ref, w2_ref, b2_ref, g_ref):
    z = jnp.dot(m_ref[...], w1_ref[...], preferred_element_type=jnp.float32)
    z = z + b1_ref[...]
    z = z * jax.nn.sigmoid(z)
    g = jnp.dot(z, w2_ref[...], preferred_element_type=jnp.float32)
    g = g + b2_ref[...]
    g_ref[...] = jax.nn.sigmoid(g)


# ----------------------------- layer wrappers -----------------------------

def channel_mean(x):
    """Per-image channel mean of an NHWC activation."""
    B, H, W, C = x.shape
    TC = _lane_tile(C, 256)
    out = pl.pallas_call(
        functools.partial(_mean_kernel, inv_hw=1.0 / (H * W)),
        out_shape=jax.ShapeDtypeStruct((B, 1, C), jnp.float32),
        grid=(B, C // TC),
        in_specs=[pl.BlockSpec((1, H, W, TC), lambda bb, c: (bb, 0, 0, c))],
        out_specs=pl.BlockSpec((1, 1, TC), lambda bb, c: (bb, 0, c)),
        compiler_params=pltpu.CompilerParams(
            dimension_semantics=("parallel", "parallel"),
            vmem_limit_bytes=VMEM_LIMIT),
    )(x)
    return out.reshape(B, C)


def matmul_fused(x, w, b, *, act="none", gate=None, residual=None,
                 rows_per_batch=None, pool=False, store_out=True,
                 out_dtype=jnp.bfloat16):
    """(M, K) @ (K, N) + bias with fused activation; optionally a per-image
    SE gate on the LHS, a residual add, and a fused per-image global average
    pool of the output (second output)."""
    M, K = x.shape
    N = w.shape[1]
    rpb = rows_per_batch if rows_per_batch is not None else M
    nb = M // rpb
    x = x.astype(jnp.bfloat16)
    want_pool = pool

    fuse_batch = (gate is not None) or want_pool
    TM = _row_tile(rpb if fuse_batch else M, ROW_TILE_TARGET)
    pool_outside = False
    if fuse_batch and not (TM % 8 == 0 or TM == M):
        # Tiny late-stage layer: per-image row count gives no legal (8,128)
        # tile -> apply the gate / pooling outside the kernel (few KB there).
        if gate is not None:
            x = (x.reshape(nb, rpb, K)
                 * gate[:, None, :].astype(jnp.bfloat16)).reshape(M, K)
            gate = None
        pool_outside = want_pool
        fuse_batch = False
        TM = _row_tile(M, ROW_TILE_TARGET)
    fused_pool = want_pool and not pool_outside
    store_out_eff = store_out or pool_outside

    TN = _lane_tile(N, 256)
    TK = _lane_tile(K, 512)
    ni, nj, nk = M // TM, N // TN, K // TK
    rpb_tiles = max(rpb // TM, 1)
    grid = (nj, ni, nk)                       # N tiles outermost, K innermost

    in_specs = [pl.BlockSpec((TM, TK), lambda j, i, k: (i, k))]
    inputs = [x]
    if gate is not None:
        in_specs.append(
            pl.BlockSpec((1, 1, TK), lambda j, i, k: (i // rpb_tiles, 0, k)))
        inputs.append(gate.reshape(nb, 1, K).astype(jnp.float32))
    in_specs.append(pl.BlockSpec((TK, TN), lambda j, i, k: (k, j)))
    inputs.append(w)
    in_specs.append(pl.BlockSpec((1, TN), lambda j, i, k: (0, j)))
    inputs.append(b)
    if residual is not None:
        in_specs.append(pl.BlockSpec((TM, TN), lambda j, i, k: (i, j)))
        inputs.append(residual.astype(jnp.bfloat16))

    out_shape, out_specs = [], []
    if store_out_eff:
        out_shape.append(jax.ShapeDtypeStruct((M, N), out_dtype))
        out_specs.append(pl.BlockSpec((TM, TN), lambda j, i, k: (i, j)))
    if fused_pool:
        out_shape.append(jax.ShapeDtypeStruct((nb, 1, N), jnp.float32))
        out_specs.append(
            pl.BlockSpec((1, 1, TN), lambda j, i, k: (i // rpb_tiles, 0, j)))

    kernel = functools.partial(
        _mm_kernel, nk=nk, act=act,
        has_gate=gate is not None, has_res=residual is not None,
        has_out=store_out_eff, has_pool=fused_pool,
        rpb_tiles=rpb_tiles, inv_rpb=1.0 / rpb)

    res = pl.pallas_call(
        kernel,
        out_shape=tuple(out_shape) if len(out_shape) > 1 else out_shape[0],
        grid=grid,
        in_specs=in_specs,
        out_specs=tuple(out_specs) if len(out_specs) > 1 else out_specs[0],
        scratch_shapes=([pltpu.VMEM((TM, TN), jnp.float32)] if nk > 1 else []),
        compiler_params=pltpu.CompilerParams(
            # pooled output is revisited across the M axis -> mark it
            # "arbitrary" when pooling; N tiles stay megacore-parallel.
            dimension_semantics=("parallel",
                                 "arbitrary" if fused_pool else "parallel",
                                 "arbitrary"),
            vmem_limit_bytes=VMEM_LIMIT),
    )(*inputs)

    if len(out_shape) > 1:
        out, pooled = res
        pooled = pooled.reshape(nb, N)
    elif fused_pool:
        out, pooled = None, res.reshape(nb, N)
    else:
        out, pooled = res, None

    if pool_outside:
        pooled = channel_mean(out.reshape(nb, rpb, 1, N))
    if want_pool and store_out:
        return out, pooled
    if want_pool:
        return pooled
    return out


def conv1x1_act(x, w, b, act="silu"):
    B, H, W, C = x.shape
    out = matmul_fused(x.reshape(B * H * W, C), w, b, act=act)
    return out.reshape(B, H, W, -1)


def conv3x3_dense(x, wk, b, stride, pool=False):
    """Dense 3x3 conv + BN + SiLU; 9 taps folded into the contraction axis
    (K = 9*Cin) so small-Cin convs use the MXU's full K width."""
    B, H, W, Cin = x.shape
    Ho = (H - 1) // stride + 1
    Wo = (W - 1) // stride + 1
    xp = jnp.pad(x, ((0, 0), (1, 1), (1, 1), (0, 0)))
    cols = []
    for ky in range(3):
        for kx in range(3):
            cols.append(xp[:, ky:ky + stride * (Ho - 1) + 1:stride,
                            kx:kx + stride * (Wo - 1) + 1:stride, :])
    patches = jnp.concatenate(cols, axis=-1).reshape(B * Ho * Wo, 9 * Cin)
    res = matmul_fused(patches, wk, b, act="silu",
                       rows_per_batch=Ho * Wo, pool=pool)
    if pool:
        out, mean = res
        return out.reshape(B, Ho, Wo, -1), mean
    return res.reshape(B, Ho, Wo, -1)


def dwconv3x3(x, w9, b, stride):
    """Depthwise 3x3 + BN + SiLU directly from the padded activation.
    Returns (h, per-image channel mean of h) -- the mean feeds SE."""
    B, H, W, C = x.shape
    xp = jnp.pad(x, ((0, 0), (1, 1), (1, 1), (0, 0)))
    TC = _lane_tile(C, 256)
    fused_pool = (stride == 1)

    out_shape = [jax.ShapeDtypeStruct((B, H, W, C), jnp.bfloat16)]
    out_specs = [pl.BlockSpec((1, H, W, TC), lambda bb, c: (bb, 0, 0, c))]
    if fused_pool:
        out_shape.append(jax.ShapeDtypeStruct((B, 1, C), jnp.float32))
        out_specs.append(pl.BlockSpec((1, 1, TC), lambda bb, c: (bb, 0, c)))

    res = pl.pallas_call(
        functools.partial(_dw_kernel, pool=fused_pool, inv_hw=1.0 / (H * W)),
        out_shape=tuple(out_shape) if fused_pool else out_shape[0],
        grid=(B, C // TC),
        in_specs=[
            pl.BlockSpec((1, H + 2, W + 2, TC), lambda bb, c: (bb, 0, 0, c)),
            pl.BlockSpec((9, TC), lambda bb, c: (0, c)),
            pl.BlockSpec((1, TC), lambda bb, c: (0, c))],
        out_specs=tuple(out_specs) if fused_pool else out_specs[0],
        compiler_params=pltpu.CompilerParams(
            dimension_semantics=("parallel", "parallel"),
            vmem_limit_bytes=VMEM_LIMIT),
    )(xp, w9, b)

    if stride == 1:
        h, mean = res
        return h, mean.reshape(B, C)
    h = res[:, ::2, ::2, :]
    return h, channel_mean(h)


def se_gate(mean, se):
    """SE excitation: (B, C) channel means -> FC + SiLU -> FC + sigmoid."""
    B, C = mean.shape
    mid = se["w1"].shape[1]
    return pl.pallas_call(
        _se_fc_kernel,
        out_shape=jax.ShapeDtypeStruct((B, C), jnp.float32),
        grid=(1,),
        in_specs=[pl.BlockSpec((B, C), lambda i: (0, 0)),
                  pl.BlockSpec((C, mid), lambda i: (0, 0)),
                  pl.BlockSpec((1, mid), lambda i: (0, 0)),
                  pl.BlockSpec((mid, C), lambda i: (0, 0)),
                  pl.BlockSpec((1, C), lambda i: (0, 0))],
        out_specs=pl.BlockSpec((B, C), lambda i: (0, 0)),
        compiler_params=pltpu.CompilerParams(
            dimension_semantics=("arbitrary",),
            vmem_limit_bytes=VMEM_LIMIT),
    )(mean, se["w1"], se["b1"], se["w2"], se["b2"])


def mbconv(x, p):
    B, H, W, Cin = x.shape
    if p["not_fuse"]:
        h = conv1x1_act(x, p["expand_w"], p["expand_b"], act="silu")
        h, mean = dwconv3x3(h, p["dw_w"], p["dw_b"], p["stride"])
    else:   # fused MBConv: the 3x3 also emits the SE channel means
        h, mean = conv3x3_dense(x, p["fuse_w"], p["fuse_b"], p["stride"],
                                pool=True)
    gate = se_gate(mean, p["se"])                       # (B, hidden) f32
    _, Ho, Wo, Ch = h.shape
    res = x.reshape(B * H * W, Cin) if p["identity"] else None
    out = matmul_fused(h.reshape(B * Ho * Wo, Ch), p["proj_w"], p["proj_b"],
                       act="none", gate=gate, residual=res,
                       rows_per_batch=Ho * Wo)
    return out.reshape(B, Ho, Wo, -1)


# ----------------------------- params (BN pre-folded) ----------------------

def _bn_init(c):
    return dict(gamma=jnp.ones((c,), jnp.float32),
                beta=jnp.zeros((c,), jnp.float32),
                mean=jnp.zeros((c,), jnp.float32),
                var=jnp.ones((c,), jnp.float32))


def _fold_bn(bn):
    s = bn["gamma"] / jnp.sqrt(bn["var"] + BN_EPS)
    return s, bn["beta"] - bn["mean"] * s


def _fold_conv1x1(w, bn):                    # w (Cin, Cout)
    s, b = _fold_bn(bn)
    return (w * s[None, :]).astype(jnp.bfloat16), b.reshape(1, -1).astype(jnp.float32)


def _fold_conv3x3(w, bn):                    # w (3,3,Cin,Cout) -> (9*Cin, Cout)
    s, b = _fold_bn(bn)
    cin, cout = w.shape[2], w.shape[3]
    wf = (w * s).reshape(9 * cin, cout).astype(jnp.bfloat16)
    return wf, b.reshape(1, -1).astype(jnp.float32)


def _fold_dw(w, bn):                         # w (3,3,C) -> (9, C)
    s, b = _fold_bn(bn)
    return (w * s).reshape(9, -1).astype(jnp.float32), b.reshape(1, -1).astype(jnp.float32)


def _conv_init(key, kh, kw, cin, cout):
    n = kh * kw * cout
    return math.sqrt(2.0 / n) * jax.random.normal(key, (kh, kw, cin, cout),
                                                  jnp.float32)


def _linear_init(key, cin, cout):
    w = 0.001 * jax.random.normal(key, (cin, cout), jnp.float32)
    return w, jnp.zeros((cout,), jnp.float32)


def build_effnetv2_params(key, cfgs, num_classes=2, width_mult=1.0):
    keys = iter(jax.random.split(key, 512))
    params = {"num_classes": num_classes}
    input_channel = _make_divisible(24 * width_mult, 8)
    w = _conv_init(next(keys), 3, 3, 3, input_channel)
    params["stem_w"], params["stem_b"] = _fold_conv3x3(w, _bn_init(input_channel))

    blocks = []
    for t, c, n, s, use_se in cfgs:
        output_channel = _make_divisible(c * width_mult, 8)
        for i in range(n):
            stride = s if i == 0 else 1
            hidden = round(input_channel * t)
            p = dict(stride=stride, not_fuse=bool(use_se),
                     identity=(stride == 1 and input_channel == output_channel))
            if use_se:
                w = _conv_init(next(keys), 1, 1, input_channel,
                               hidden).reshape(input_channel, hidden)
                p["expand_w"], p["expand_b"] = _fold_conv1x1(w, _bn_init(hidden))
                wd = math.sqrt(2.0 / (9 * hidden)) * jax.random.normal(
                    next(keys), (3, 3, hidden), jnp.float32)
                p["dw_w"], p["dw_b"] = _fold_dw(wd, _bn_init(hidden))
            else:
                w = _conv_init(next(keys), 3, 3, input_channel, hidden)
                p["fuse_w"], p["fuse_b"] = _fold_conv3x3(w, _bn_init(hidden))
            mid = _make_divisible(input_channel // 4, 8)
            w1, b1 = _linear_init(next(keys), hidden, mid)
            w2, b2 = _linear_init(next(keys), mid, hidden)
            p["se"] = dict(w1=w1, b1=b1.reshape(1, -1),
                           w2=w2, b2=b2.reshape(1, -1))
            w = _conv_init(next(keys), 1, 1, hidden,
                           output_channel).reshape(hidden, output_channel)
            p["proj_w"], p["proj_b"] = _fold_conv1x1(w, _bn_init(output_channel))
            blocks.append(p)
            input_channel = output_channel
    params["blocks"] = blocks

    output_channel = (_make_divisible(1792 * width_mult, 8)
                      if width_mult > 1.0 else 1792)
    w = _conv_init(next(keys), 1, 1, input_channel,
                   output_channel).reshape(input_channel, output_channel)
    params["head_w"], params["head_b"] = _fold_conv1x1(w, _bn_init(output_channel))

    wc, bc = _linear_init(next(keys), output_channel, num_classes)
    npad = max(128, ((num_classes + 127) // 128) * 128)
    params["cls_w"] = jnp.zeros((output_channel, npad), jnp.bfloat16
                                ).at[:, :num_classes].set(wc.astype(jnp.bfloat16))
    params["cls_b"] = jnp.zeros((1, npad), jnp.float32).at[0, :num_classes].set(bc)
    return params


def effnetv2_forward(params, x_nchw):
    """NCHW float input (PyTorch convention) -> logits; NHWC / bf16 inside."""
    x = jnp.transpose(x_nchw, (0, 2, 3, 1)).astype(jnp.bfloat16)
    x = conv3x3_dense(x, params["stem_w"], params["stem_b"], stride=2)
    for p in params["blocks"]:
        x = mbconv(x, p)
    B, H, W, C = x.shape
    # Head 1x1 + BN + SiLU with the global average pool fused into its
    # epilogue (pool-only output -> head activation never hits HBM).
    pooled = matmul_fused(x.reshape(B * H * W, C), params["head_w"],
                          params["head_b"], act="silu",
                          rows_per_batch=H * W, pool=True, store_out=False)
    logits = matmul_fused(pooled, params["cls_w"], params["cls_b"],
                          act="none", out_dtype=jnp.float32)
    return logits[:, :params["num_classes"]]


if __name__ == "__main__":
    # small EffNetV2 config: (expand t, channels c, repeats n, stride s, use_se)
    cfgs = [
        [1, 24, 1, 1, 0],   # fused MBConv, identity residual, fused SE pool
        [4, 32, 1, 2, 0],   # fused MBConv, downsample
        [4, 48, 1, 2, 1],   # MBConv: expand + depthwise (stride 2) + SE + proj
        [4, 48, 1, 1, 1],   # MBConv: depthwise stride 1 (fused SE pool), identity
    ]
    key = jax.random.PRNGKey(0)
    pkey, xkey = jax.random.split(key)
    params = build_effnetv2_params(pkey, cfgs, num_classes=2, width_mult=1.0)

    x = jax.random.normal(xkey, (2, 3, 32, 32), jnp.float32)  # NCHW like PyTorch
    out = effnetv2_forward(params, x)
    out = jax.block_until_ready(out)
    assert out.shape == (2, 2), out.shape
    print("KERNEL_OK")
</pallas_src>

<mosaic_0001>
module attributes {stable_mosaic.version = 11 : i64} {
  func.func @_mm_kernel(%arg0: i32, %arg1: i32, %arg2: i32, %arg3: memref<512x27xbf16, #tpu.memory_space<vmem>>, %arg4: memref<27x24xbf16, #tpu.memory_space<vmem>>, %arg5: memref<1x24xf32, #tpu.memory_space<vmem>>, %arg6: memref<512x24xbf16, #tpu.memory_space<vmem>>) attributes {dimension_semantics = [#tpu.dimension_semantics<parallel>, #tpu.dimension_semantics<parallel>, #tpu.dimension_semantics<arbitrary>], iteration_bounds = array<i64: 1, 1, 1>, scalar_prefetch = 0 : i64, scratch_operands = 0 : i64, tpu.core_type = #tpu.core_type<tc>, window_params = [{transform_indices = @transform_0, window_bounds = array<i64: 512, 27>}, {transform_indices = @transform_1, window_bounds = array<i64: 27, 24>}, {transform_indices = @transform_2, window_bounds = array<i64: 1, 24>}, {transform_indices = @transform_3, window_bounds = array<i64: 512, 24>}]} {
    %c0 = arith.constant 0 : index
    %c0_0 = arith.constant 0 : index
    %0 = vector.load %arg3[%c0, %c0_0] : memref<512x27xbf16, #tpu.memory_space<vmem>>, vector<512x27xbf16>
    %c0_1 = arith.constant 0 : index
    %c0_2 = arith.constant 0 : index
    %1 = vector.load %arg4[%c0_1, %c0_2] : memref<27x24xbf16, #tpu.memory_space<vmem>>, vector<27x24xbf16>
    %cst = arith.constant dense<0.000000e+00> : vector<512x24xf32>
    %2 = tpu.matmul %0, %1, %cst {dimension_numbers = #tpu.dot_dimension_numbers<[1], [0], [0], [1], [0, 0, 1, 1], [], []>} : vector<512x27xbf16>, vector<27x24xbf16>, vector<512x24xf32> -> vector<512x24xf32>
    %c0_i32 = arith.constant 0 : i32
    %3 = arith.cmpi eq, %arg2, %c0_i32 : i32
    %4 = arith.extui %3 : i1 to i32
    %c0_i32_3 = arith.constant 0 : i32
    %5 = arith.cmpi ne, %4, %c0_i32_3 : i32
    scf.if %5 {
      %c0_4 = arith.constant 0 : index
      %c0_5 = arith.constant 0 : index
      %6 = vector.load %arg5[%c0_4, %c0_5] : memref<1x24xf32, #tpu.memory_space<vmem>>, vector<1x24xf32>
      %7 = vector.broadcast %6 : vector<1x24xf32> to vector<512x24xf32>
      %8 = arith.addf %2, %7 : vector<512x24xf32>
      %9 = arith.negf %8 : vector<512x24xf32>
      %10 = math.exp %9 : vector<512x24xf32>
      %cst_6 = arith.constant 1.000000e+00 : f32
      %11 = vector.broadcast %cst_6 : f32 to vector<512x24xf32>
      %12 = arith.addf %11, %10 : vector<512x24xf32>
      %13 = arith.divf %11, %12 : vector<512x24xf32>
      %14 = arith.mulf %8, %13 : vector<512x24xf32>
      %15 = arith.truncf %14 : vector<512x24xf32> to vector<512x24xbf16>
      %c0_7 = arith.constant 0 : index
      %c0_8 = arith.constant 0 : index
      %16 = vector.load %arg6[%c0_7, %c0_8] : memref<512x24xbf16, #tpu.memory_space<vmem>>, vector<512x24xbf16>
      tpu.vector_store %arg6[%c0_7, %c0_8], %15 {strides = array<i32>} : memref<512x24xbf16, #tpu.memory_space<vmem>>, vector<512x24xbf16>,
    } else {
    }
    return
  }
  func.func @transform_0(%arg0: i32, %arg1: i32, %arg2: i32) -> (i32, i32) {
    %c0_i32 = arith.constant 0 : i32
    return %arg1, %arg2 : i32, i32
  }
  func.func @transform_1(%arg0: i32, %arg1: i32, %arg2: i32) -> (i32, i32) {
    %c0_i32 = arith.constant 0 : i32
    return %arg2, %arg0 : i32, i32
  }
  func.func @transform_2(%arg0: i32, %arg1: i32, %arg2: i32) -> (i32, i32) {
    %c0_i32 = arith.constant 0 : i32
    %c0_i32_0 = arith.constant 0 : i32
    return %c0_i32, %arg0 : i32, i32
  }
  func.func @transform_3(%arg0: i32, %arg1: i32, %arg2: i32) -> (i32, i32) {
    %c0_i32 = arith.constant 0 : i32
    return %arg1, %arg0 : i32, i32
  }
}

</mosaic_0001>

<bundles_post_ra>
// kernel: tpu_custom_call.1
= control target key start
LH: loop header
LB: loop body
LE: loop exit
PB: predicated region body
PF: predicated region fallthrough
CT: control target
= control target key end

     0   :  { %8 = vsyncpa [#allocation3], 0  ;;  %s2859_s0 = inlined_call_operand.hbm [shape: bf16[512,27], index: 0, kind: input, shape index: {}]   ;;  %s2860_s1 = inlined_call_operand.hbm [shape: bf16[27,24], index: 1, kind: input, shape index: {}]   ;;  %s2861_s2 = inlined_call_operand.hbm [shape: f32[1,24], index: 2, kind: input, shape index: {}]   ;;  %s2862_s3 = inlined_call_operand.hbm [shape: bf16[512,24], index: 3, kind: output, shape index: {}]  }
   0x1   :  { %9 = vsyncpa [#allocation6], 0 }
   0x2   :  { %10 = vsyncpa [#allocation4], 0  ;;  %s2242_s12 = smov [#allocation5]   ;;  %s2243_s14 = smov [#allocation2]  }
   0x3   :  { %s28_s13 = sshll.u32 %s2242_s12, 4  ;;  %s16_s15 = sshll.u32 %s2243_s14, 4  ;;  %s29_s13 = int_to_ptr.vmem [resolvable:$true] %s28_s13  ;;  %s2269_s15 = int_to_ptr.vmem [resolvable:$true] %s16_s15 }
   0x4   :  { %s2148_s18 = scalar_lea.hbm %s2860_s1, 256 }
   0x5   :  { %p2149_p0 = scmp.ne.s32.totalorder %s2860_s1, %s2148_s18  ;;  %p2152_p1 = scmp.lt.u32.totalorder %s2148_s18, %s2860_s1 }
   0x7   :  { %p2154_p2 = pnand %p2152_p1, %p2149_p0 }
   0x9   :  { %2157 = shalt.err (!%p2154_p2)
}
   0xa   :  { %s2158_s23 = scalar_lea.vmem %s29_s13, 256  ;;  %p2163_p4 = scmp.lt.s32.totalorder %s29_s13, %s29_s13 }
   0xb   :  { %p2159_p3 = scmp.ne.s32.totalorder %s29_s13, %s2158_s23  ;;  %p2164_p5 = scmp.lt.s32.totalorder %s2158_s23, %s2158_s23 }
   0xd   :  { %p2165_p6 = por %p2164_p5, %p2163_p4 }
   0xf   :  { %p2166_p7 = pnand %p2165_p6, %p2159_p3 }
  0x11   :  { %2169 = shalt.err (!%p2166_p7)
}
  0x12   :  { %s2244_s24 = smov 64   ;;  %s2245_s25 = smov 4  }
  0x13   :  { %34 = dma.hbm_to_vmem [thread:$0]  %s2860_s1, 256, %s29_s13, [#allocation6], %s2244_s24, %s2244_s24, %s2245_s25  }
  0x14   :  { %s2170_s30 = scalar_lea.hbm %s2859_s0, 4096 }
  0x15   :  { %p2171_p8 = scmp.ne.s32.totalorder %s2859_s0, %s2170_s30  ;;  %p2174_p9 = scmp.lt.u32.totalorder %s2170_s30, %s2859_s0 }
  0x17   :  { %p2176_p10 = pnand %p2174_p9, %p2171_p8 }
  0x19   :  { %2179 = shalt.err (!%p2176_p10)
}
  0x1a   :  { %s2180_s8 = scalar_lea.vmem %s2269_s15, 4096  ;;  %p2185_p12 = scmp.lt.s32.totalorder %s2269_s15, %s2269_s15 }
  0x1b   :  { %p2181_p11 = scmp.ne.s32.totalorder %s2269_s15, %s2180_s8  ;;  %p2186_p13 = scmp.lt.s32.totalorder %s2180_s8, %s2180_s8 }
  0x1d   :  { %p2187_p0 = por %p2186_p13, %p2185_p12 }
  0x1f   :  { %p2188_p1 = pnand %p2187_p0, %p2181_p11 }
  0x21   :  { %2191 = shalt.err (!%p2188_p1)
}
  0x22   :  { %22 = dma.hbm_to_vmem [thread:$0]  %s2859_s0, 4096, %s2269_s15, [#allocation3], %s2244_s24, %s2244_s24, %s2245_s25  }
  0x23   :  { %s2246_s10 = smov [#allocation7]   ;;  %s2192_s14 = scalar_lea.hbm %s2861_s2, 16 }
  0x24   :  { %s41_s11 = sshll.u32 %s2246_s10, 4  ;;  %p2193_p2 = scmp.ne.s32.totalorder %s2861_s2, %s2192_s14  ;;  %s42_s11 = int_to_ptr.vmem [resolvable:$true] %s41_s11 }
  0x25   :  { %p2196_p3 = scmp.lt.u32.totalorder %s2192_s14, %s2861_s2 }
  0x27   :  { %p2198_p4 = pnand %p2196_p3, %p2193_p2 }
  0x29   :  { %2201 = shalt.err (!%p2198_p4)
}
  0x2a   :  { %s2202_s20 = scalar_lea.vmem %s42_s11, 16  ;;  %s2206_s0 = scalar_lea.vmem %s42_s11, 32 }
  0x2b   :  { %p2203_p5 = scmp.ne.s32.totalorder %s42_s11, %s2202_s20  ;;  %p2207_p6 = scmp.lt.s32.totalorder %s42_s11, %s42_s11 }
  0x2c   :  { %p2208_p7 = scmp.lt.s32.totalorder %s2206_s0, %s2202_s20 }
  0x2e   :  { %p2209_p8 = por %p2208_p7, %p2207_p6 }
  0x30   :  { %p2210_p9 = pnand %p2209_p8, %p2203_p5 }
  0x32   :  { %2213 = shalt.err (!%p2210_p9)
}
  0x33   :  { %44 = dma.hbm_to_vmem [thread:$0]  %s2861_s2, 16, %s42_s11, [#allocation6]  }
  0x34   :  { %2236 = dma.done.wait [#allocation3], 4096  }
  0x35   :  { %2237 = vsyncadd [#allocation3], 4294963200 }
  0x36   :  { %2238 = dma.done.wait [#allocation6], 272  }
  0x37   :  { %2239 = vsyncadd [#allocation6], 4294967024  ;;  %vm402_vm0 = vcmask 1044480   ;;  %vm403_vm1 = vcmask 1045504   ;;  %v2247_v0 = vmov 65535   ;;  %vm305_vm2 = vcmask 220160  }
  0x38   :  { %v404_v1 = vsel %vm402_vm0, 4294967295, %v2247_v0  ;;  %v1857_v2 = vld [vmem:[#allocation5] sm:$0xff]   ;;  %v1858_v4 = vld [vmem:[#allocation5 + $0x8] sm:$0x3f]   ;;  %v1863_v10 = vld [vmem:[#allocation2 + $0x10] sm:$0xff]   ;;  %vm1402_vm3 = vcmask 191488  }
  0x39   :  { %v405_v3 = vsel %vm403_vm1, %v404_v1, 0  ;;  %1778 = vmatprep.subr.bf16.mxu0 %v1857_v2  ;;  %1846 = vmatprep.subr.bf16.mxu1 %v1857_v2  ;;  %v1859_v5 = vld [vmem:[#allocation2] sm:$0xff]   ;;  %v1861_v8 = vld [vmem:[#allocation2 + $0x8] sm:$0xff]   ;;  %v1864_v11 = vld [vmem:[#allocation2 + $0x90] sm:$0xff]   ;;  %s2248_s2 = smov [#allocation8]  }
  0x3a   :  { %1779 = vmatpush3.bf16.msra.mxu0 %v1857_v2  ;;  %1848 = vmatpush3.bf16.msra.mxu1 %v1857_v2  ;;  %v407_v6 = vand.u32 %v1858_v4, %v405_v3  ;;  %v1860_v7 = vld [vmem:[#allocation2 + $0x80] sm:$0xff]   ;;  %v1862_v9 = vld [vmem:[#allocation2 + $0x88] sm:$0xff]   ;;  %v1865_v12 = vld [vmem:[#allocation2 + $0x18] sm:$0xff]   ;;  %s1472_s22 = sshll.u32 %s2248_s2, 4  ;;  %s1473_s22 = int_to_ptr.vmem [resolvable:$true] %s1472_s22 }
  0x3b   :  { %1782 = vmatprep.mubr.msk.bf16.mxu0 %vm305_vm2, %v1859_v5  ;;  %1814 = vmatprep.mubr.msk.bf16.mxu1 %vm305_vm2, %v1860_v7  ;;  %v1866_v13 = vld [vmem:[#allocation2 + $0x98] sm:$0xff]   ;;  %v1867_v14 = vld [vmem:[#allocation2 + $0x20] sm:$0xff]   ;;  %v1869_v16 = vld [vmem:[#allocation2 + $0x28] sm:$0xff]   ;;  %s2214_s23 = scalar_lea.vmem %s1473_s22, 4096  ;;  %p2219_p11 = scmp.lt.s32.totalorder %s1473_s22, %s1473_s22 }
  0x3c   :  { %1780 = vmatprep.subr.bf16.mxu0 %v407_v6  ;;  %1847 = vmatprep.subr.bf16.mxu1 %v407_v6  ;;  %v1868_v15 = vld [vmem:[#allocation2 + $0xa0] sm:$0xff]   ;;  %v1870_v17 = vld [vmem:[#allocation2 + $0xa8] sm:$0xff]   ;;  %v1871_v18 = vld [vmem:[#allocation2 + $0x30] sm:$0xff]   ;;  %p2215_p10 = scmp.ne.s32.totalorder %s1473_s22, %s2214_s23  ;;  %p2220_p12 = scmp.lt.s32.totalorder %s2214_s23, %s2214_s23 }
  0x3d   :  { %v1872_v19 = vld [vmem:[#allocation2 + $0xb0] sm:$0xff]   ;;  %v1873_v20 = vld [vmem:[#allocation2 + $0x38] sm:$0xff]   ;;  %v1875_v22 = vld [vmem:[#allocation2 + $0x40] sm:$0xff]  }
  0x3e   :  { %1781 = vmatpush3.bf16.msra.mxu0 %v407_v6  ;;  %1849 = vmatpush3.bf16.msra.mxu1 %v407_v6  ;;  %v1874_v21 = vld [vmem:[#allocation2 + $0xb8] sm:$0xff]   ;;  %v1876_v23 = vld [vmem:[#allocation2 + $0xc0] sm:$0xff]   ;;  %v1877_v24 = vld [vmem:[#allocation2 + $0x48] sm:$0xff]   ;;  %p2221_p13 = por %p2220_p12, %p2219_p11 }
  0x3f   :  { %v1878_v25 = vld [vmem:[#allocation2 + $0xc8] sm:$0xff]   ;;  %v1879_v26 = vld [vmem:[#allocation2 + $0x50] sm:$0xff]   ;;  %v1881_v28 = vld [vmem:[#allocation2 + $0x58] sm:$0xff]  }
  0x40   :  { %v1880_v27 = vld [vmem:[#allocation2 + $0xd0] sm:$0xff]   ;;  %v1882_v29 = vld [vmem:[#allocation2 + $0xd8] sm:$0xff]   ;;  %v1883_v30 = vld [vmem:[#allocation2 + $0x60] sm:$0xff]   ;;  %p2222_p0 = pnand %p2221_p13, %p2215_p10 }
  0x41   :  { %1783 = vmatmul.mubr.msk.bf16.vlgmr.msra.gmra.mrb[0].mxu0 %vm305_vm2, %v1861_v8  ;;  %1815 = vmatmul.mubr.msk.bf16.vlgmr.msra.gmra.mrb[0].mxu1 %vm305_vm2, %v1862_v9  ;;  %v1884_v31 = vld [vmem:[#allocation2 + $0xe0] sm:$0xff]   ;;  %v1885_v32 = vld [vmem:[#allocation2 + $0x68] sm:$0xff]   ;;  %v1887_v34 = vld [vmem:[#allocation2 + $0x70] sm:$0xff]  }
  0x42   :  { %1786 = vmatprep.mubr.msk.bf16.mxu0 %vm305_vm2, %v1863_v10  ;;  %1818 = vmatprep.mubr.msk.bf16.mxu1 %vm305_vm2, %v1864_v11  ;;  %v1886_v33 = vld [vmem:[#allocation2 + $0xe8] sm:$0xff]   ;;  %v1888_v35 = vld [vmem:[#allocation2 + $0xf0] sm:$0xff]   ;;  %v1889_v36 = vld [vmem:[#allocation2 + $0x78] sm:$0xff]  }
  0x43   :  { %v1890_v37 = vld [vmem:[#allocation2 + $0xf8] sm:$0xff]   ;;  %v2350_v38 = vld [vmem:[#allocation7] ss:$0 sm:$0xff] }
  0x49   :  { %1787 = vmatmul.mubr.msk.bf16.gmra.mrb[4].mxu0 %vm305_vm2, %v1865_v12  ;;  %1819 = vmatmul.mubr.msk.bf16.gmra.mrb[4].mxu1 %vm305_vm2, %v1866_v13 }
  0x4a   :  { %1790 = vmatprep.mubr.msk.bf16.mxu0 %vm305_vm2, %v1867_v14  ;;  %1822 = vmatprep.mubr.msk.bf16.mxu1 %vm305_vm2, %v1868_v15 }
  0x51   :  { %1791 = vmatmul.mubr.msk.bf16.gmra.mrb[8].mxu0 %vm305_vm2, %v1869_v16  ;;  %1823 = vmatmul.mubr.msk.bf16.gmra.mrb[8].mxu1 %vm305_vm2, %v1870_v17 }
  0x52   :  { %1794 = vmatprep.mubr.msk.bf16.mxu0 %vm305_vm2, %v1871_v18  ;;  %1826 = vmatprep.mubr.msk.bf16.mxu1 %vm305_vm2, %v1872_v19 }
  0x59   :  { %1795 = vmatmul.mubr.msk.bf16.gmra.mrb[12].mxu0 %vm305_vm2, %v1873_v20  ;;  %1827 = vmatmul.mubr.msk.bf16.gmra.mrb[12].mxu1 %vm305_vm2, %v1874_v21 }
  0x5a   :  { %1798 = vmatprep.mubr.msk.bf16.mxu0 %vm305_vm2, %v1875_v22  ;;  %1830 = vmatprep.mubr.msk.bf16.mxu1 %vm305_vm2, %v1876_v23 }
  0x61   :  { %1799 = vmatmul.mubr.msk.bf16.gmra.mrb[16].mxu0 %vm305_vm2, %v1877_v24  ;;  %1831 = vmatmul.mubr.msk.bf16.gmra.mrb[16].mxu1 %vm305_vm2, %v1878_v25 }
  0x62   :  { %1802 = vmatprep.mubr.msk.bf16.mxu0 %vm305_vm2, %v1879_v26  ;;  %1834 = vmatprep.mubr.msk.bf16.mxu1 %vm305_vm2, %v1880_v27 }
  0x69   :  { %1803 = vmatmul.mubr.msk.bf16.gmra.mrb[20].mxu0 %vm305_vm2, %v1881_v28  ;;  %1835 = vmatmul.mubr.msk.bf16.gmra.mrb[20].mxu1 %vm305_vm2, %v1882_v29 }
  0x6a   :  { %1806 = vmatprep.mubr.msk.bf16.mxu0 %vm305_vm2, %v1883_v30  ;;  %1838 = vmatprep.mubr.msk.bf16.mxu1 %vm305_vm2, %v1884_v31 }
  0x71   :  { %1807 = vmatmul.mubr.msk.bf16.gmra.mrb[24].mxu0 %vm305_vm2, %v1885_v32  ;;  %1839 = vmatmul.mubr.msk.bf16.gmra.mrb[24].mxu1 %vm305_vm2, %v1886_v33 }
  0x72   :  { %1810 = vmatprep.mubr.msk.bf16.mxu0 %vm305_vm2, %v1887_v34  ;;  %1842 = vmatprep.mubr.msk.bf16.mxu1 %vm305_vm2, %v1888_v35 }
  0x79   :  { %1811 = vmatmul.mubr.msk.bf16.gmra.mrb[28].mxu0 %vm305_vm2, %v1889_v36  ;;  %1843 = vmatmul.mubr.msk.bf16.gmra.mrb[28].mxu1 %vm305_vm2, %v1890_v37 }
 0x114   :  { %v1784_v39 = vpop.f32.mrb[0].mxu0  ;;  %v1816_v40 = vpop.f32.mrb[0].mxu1 }
 0x115   :  { %v2353_v41 = vadd.f32 %v1784_v39, %v2350_v38  ;;  %v2356_v42 = vadd.f32 %v1816_v40, %v2350_v38  ;;  %v443_v43 = vpop.f32.mrb[1].mxu0  ;;  %v571_v44 = vpop.f32.mrb[1].mxu1 }
 0x116   :  { %v2359_v45 = vadd.f32 %v2350_v38, %v443_v43  ;;  %v2362_v46 = vadd.f32 %v2350_v38, %v571_v44  ;;  %v1785_v47 = vpop.f32.mrb[2].mxu0  ;;  %v1817_v48 = vpop.f32.mrb[2].mxu1 }
 0x117   :  { %v1554_v49 = vmul.f32 -1.442695, %v2353_v41  ;;  %v1586_v50 = vmul.f32 -1.442695, %v2356_v42  ;;  %v2367_v51 = vadd.f32 %v1785_v47, %v2350_v38  ;;  %v2370_v52 = vadd.f32 %v1817_v48, %v2350_v38  ;;  %v446_v53 = vpop.f32.mrb[3].mxu0  ;;  %v574_v54 = vpop.f32.mrb[3].mxu1 }
 0x118   :  { %v1552_v55 = vmul.f32 -1.442695, %v2359_v45  ;;  %v1584_v56 = vmul.f32 -1.442695, %v2362_v46  ;;  %v2375_v57 = vadd.f32 %v2350_v38, %v446_v53  ;;  %v2378_v58 = vadd.f32 %v2350_v38, %v574_v54 }
 0x119   :  { %1891 = vpow2.f32 %v1554_v49  ;;  %v1555_v59 = vmul.f32 -1.442695, %v2367_v51  ;;  %v1587_v60 = vmul.f32 -1.442695, %v2370_v52 }
 0x11a   :  { %1893 = vpow2.f32 %v1586_v50  ;;  %v1553_v61 = vmul.f32 -1.442695, %v2375_v57  ;;  %v1585_v62 = vmul.f32 -1.442695, %v2378_v58 }
 0x11b   :  { %1895 = vpow2.f32 %v1552_v55 }
 0x11c   :  { %1897 = vpow2.f32 %v1584_v56  ;;  %v1788_v63 = vpop.f32.mrb[4].mxu0  ;;  %v1820_v0 = vpop.f32.mrb[4].mxu1 }
 0x11d   :  { %1899 = vpow2.f32 %v1555_v59  ;;  %v2385_v1 = vadd.f32 %v1788_v63, %v2350_v38  ;;  %v2388_v2 = vadd.f32 %v1820_v0, %v2350_v38  ;;  %v459_v3 = vpop.f32.mrb[5].mxu0  ;;  %v587_v4 = vpop.f32.mrb[5].mxu1 }
 0x11e   :  { %1901 = vpow2.f32 %v1587_v60  ;;  %v2391_v5 = vadd.f32 %v2350_v38, %v459_v3  ;;  %v2394_v6 = vadd.f32 %v2350_v38, %v587_v4  ;;  %v1789_v7 = vpop.f32.mrb[6].mxu0  ;;  %v1821_v8 = vpop.f32.mrb[6].mxu1 }
 0x11f   :  { %1903 = vpow2.f32 %v1553_v61  ;;  %v1558_v9 = vmul.f32 -1.442695, %v2385_v1  ;;  %v1590_v10 = vmul.f32 -1.442695, %v2388_v2  ;;  %v2399_v11 = vadd.f32 %v1789_v7, %v2350_v38  ;;  %v462_v12 = vpop.f32.mrb[7].mxu0  ;;  %v590_v13 = vpop.f32.mrb[7].mxu1 }
 0x120   :  { %1905 = vpow2.f32 %v1585_v62  ;;  %v1556_v14 = vmul.f32 -1.442695, %v2391_v5  ;;  %v1588_v15 = vmul.f32 -1.442695, %v2394_v6  ;;  %v2405_v35 = vadd.f32 %v1821_v8, %v2350_v38 }
 0x121   :  { %1907 = vpow2.f32 %v1558_v9  ;;  %v1559_v16 = vmul.f32 -1.442695, %v2399_v11  ;;  %v2408_v40 = vadd.f32 %v2350_v38, %v462_v12  ;;  %v2411_v47 = vadd.f32 %v2350_v38, %v590_v13 }
 0x122   :  { %1909 = vpow2.f32 %v1590_v10  ;;  %v1591_v55 = vmul.f32 -1.442695, %v2405_v35 }
 0x123   :  { %v1892_v17 = vpop.eup %1891  ;;  %1911 = vpow2.f32 %v1556_v14  ;;  %v1557_v62 = vmul.f32 -1.442695, %v2408_v40  ;;  %v1589_v8 = vmul.f32 -1.442695, %v2411_v47 }
 0x124   :  { %v1894_v18 = vpop.eup %1893  ;;  %v892_v19 = vadd.f32 1.0, %v1892_v17  ;;  %1913 = vpow2.f32 %v1588_v15  ;;  %v1792_v20 = vpop.f32.mrb[8].mxu0 }
 0x125   :  { %v1824_v21 = vpop.f32.mrb[8].mxu1  ;;  %v1896_v22 = vpop.eup %1895  ;;  %v924_v23 = vadd.f32 1.0, %v1894_v18  ;;  %1915 = vpow2.f32 %v1559_v16  ;;  %v2414_v50 = vadd.f32 %v1792_v20, %v2350_v38 }
 0x126   :  { %v475_v24 = vpop.f32.mrb[9].mxu0  ;;  %v603_v25 = vpop.f32.mrb[9].mxu1  ;;  %1917 = vrcp.f32 %v892_v19  ;;  %v890_v27 = vadd.f32 1.0, %v1896_v22  ;;  %v2418_v56 = vadd.f32 %v1824_v21, %v2350_v38 }
 0x127   :  { %v1898_v26 = vpop.eup %1897  ;;  %v1793_v28 = vpop.f32.mrb[10].mxu0  ;;  %1919 = vrcp.f32 %v924_v23  ;;  %v2424_v63 = vadd.f32 %v2350_v38, %v475_v24  ;;  %v2432_v9 = vadd.f32 %v2350_v38, %v603_v25  ;;  %v1562_v15 = vmul.f32 -1.442695, %v2414_v50 }
 0x128   :  { %v1825_v29 = vpop.f32.mrb[10].mxu1  ;;  %v1900_v30 = vpop.eup %1899  ;;  %v922_v31 = vadd.f32 1.0, %v1898_v26  ;;  %1921 = vrcp.f32 %v890_v27  ;;  %v1594_v20 = vmul.f32 -1.442695, %v2418_v56  ;;  %v2445_v21 = vadd.f32 %v1793_v28, %v2350_v38 }
 0x129   :  { %v478_v32 = vpop.f32.mrb[11].mxu0  ;;  %v1902_v33 = vpop.eup %1901  ;;  %v893_v34 = vadd.f32 1.0, %v1900_v30  ;;  %v1560_v25 = vmul.f32 -1.442695, %v2424_v63  ;;  %v2452_v26 = vadd.f32 %v1825_v29, %v2350_v38 }
 0x12a   :  { %v606_v36 = vpop.f32.mrb[11].mxu1  ;;  %v1904_v37 = vpop.eup %1903  ;;  %1923 = vrcp.f32 %v922_v31  ;;  %v925_v39 = vadd.f32 1.0, %v1902_v33  ;;  %v1592_v31 = vmul.f32 -1.442695, %v2432_v9  ;;  %v2457_v28 = vadd.f32 %v2350_v38, %v478_v32 }
 0x12b   :  { %v1906_v43 = vpop.eup %1905  ;;  %1925 = vrcp.f32 %v893_v34  ;;  %v891_v44 = vadd.f32 1.0, %v1904_v37 }
 0x12c   :  { %v1908_v48 = vpop.eup %1907  ;;  %1927 = vrcp.f32 %v925_v39  ;;  %v923_v49 = vadd.f32 1.0, %v1906_v43  ;;  %v2420_v59 = vpop.f32.mrb[12].mxu0 }
 0x12d   :  { %v1910_v53 = vpop.eup %1909  ;;  %1929 = vrcp.f32 %v891_v44  ;;  %v896_v54 = vadd.f32 1.0, %v1908_v48  ;;  %v2426_v0 = vpop.f32.mrb[12].mxu1 }
 0x12e   :  { %v1912_v60 = vpop.eup %1911  ;;  %1931 = vrcp.f32 %v923_v49  ;;  %v928_v61 = vadd.f32 1.0, %v1910_v53  ;;  %v2428_v3 = vpop.f32.mrb[13].mxu0 }
 0x12f   :  { %v1914_v4 = vpop.eup %1913  ;;  %1933 = vrcp.f32 %v896_v54  ;;  %v894_v7 = vadd.f32 1.0, %v1912_v60  ;;  %v2434_v10 = vpop.f32.mrb[13].mxu1 }
 0x130   :  { %v2436_v12 = vpop.f32.mrb[14].mxu0  ;;  %v1916_v13 = vpop.eup %1915  ;;  %1935 = vrcp.f32 %v928_v61  ;;  %v926_v14 = vadd.f32 1.0, %v1914_v4  ;;  %v2480_v61 = vadd.f32 %v2420_v59, %v2350_v38 }
 0x131   :  { %v2439_v16 = vpop.f32.mrb[14].mxu1  ;;  %v2441_v17 = vpop.f32.mrb[15].mxu0  ;;  %1937 = vrcp.f32 %v894_v7  ;;  %v897_v19 = vadd.f32 1.0, %v1916_v13  ;;  %v2490_v13 = vadd.f32 %v2426_v0, %v2350_v38 }
 0x132   :  { %v1918_v18 = vpop.eup %1917  ;;  %v2447_v22 = vpop.f32.mrb[15].mxu1  ;;  %1939 = vrcp.f32 %v926_v14 }
 0x133   :  { %v1920_v23 = vpop.eup %1919  ;;  %v1084_v24 = vmul.f32 %v1918_v18, %v2353_v41  ;;  %1941 = vrcp.f32 %v897_v19  ;;  %v2461_v41 = vadd.f32 %v2350_v38, %v606_v36  ;;  %v1595_v36 = vmul.f32 -1.442695, %v2452_v26 }
 0x134   :  { %v1922_v27 = vpop.eup %1921  ;;  %v1116_v30 = vmul.f32 %v1920_v23, %v2356_v42  ;;  %1943 = vpow2.f32 %v1591_v55  ;;  %v1563_v42 = vmul.f32 -1.442695, %v2445_v21  ;;  %v2465_v44 = vpop.f32.mrb[16].mxu0  ;;  %v1561_v19 = vmul.f32 -1.442695, %v2457_v28 }
 0x135   :  { %v1924_v33 = vpop.eup %1923  ;;  %v1682_v34 = vpack.c.bf16 %v1084_v24, %v1084_v24  ;;  %v1082_v37 = vmul.f32 %v1922_v27, %v2359_v45  ;;  %1945 = vpow2.f32 %v1557_v62  ;;  %v2467_v48 = vpop.f32.mrb[16].mxu1 }
 0x136   :  { %v1926_v39 = vpop.eup %1925  ;;  %v1714_v29 = vpack.c.bf16 %v1116_v30, %v1116_v30  ;;  %v1114_v43 = vmul.f32 %v1924_v33, %v2362_v46  ;;  %1947 = vpow2.f32 %v1589_v8  ;;  %v2472_v53 = vpop.f32.mrb[17].mxu0 }
 0x137   :  { %v1928_v32 = vpop.eup %1927  ;;  %1405 = vst.msk [vmem:[#allocation8 + $0x8] sm:$0xf] %vm1402_vm3, %v1682_v34  ;;  %v1680_v49 = vpack.c.bf16 %v1082_v37, %v1082_v37  ;;  %v1085_v45 = vmul.f32 %v1926_v39, %v2367_v51  ;;  %v2474_v54 = vpop.f32.mrb[17].mxu1  ;;  %1949 = vpow2.f32 %v1562_v15 }
 0x138   :  { %v1930_v46 = vpop.eup %1929  ;;  %1437 = vst.msk [vmem:[#allocation8 + $0x88] sm:$0xf] %vm1402_vm3, %v1714_v29  ;;  %v1712_v55 = vpack.c.bf16 %v1114_v43, %v1114_v43  ;;  %v1117_v60 = vmul.f32 %v1928_v32, %v2370_v52  ;;  %v2482_v62 = vpop.f32.mrb[18].mxu0  ;;  %1951 = vpow2.f32 %v1594_v20  ;;  %v1593_v20 = vmul.f32 -1.442695, %v2461_v41 }
 0x139   :  { %v2484_v51 = vpop.f32.mrb[18].mxu1  ;;  %v1932_v4 = vpop.eup %1931  ;;  %1403 = vst.msk [vmem:[#allocation8] sm:$0xf] %vm1402_vm3, %v1680_v49  ;;  %v1683_v7 = vpack.c.bf16 %v1085_v45, %v1085_v45  ;;  %v1083_v8 = vmul.f32 %v1930_v46, %v2375_v57  ;;  %1953 = vpow2.f32 %v1560_v25 }
 0x13a   :  { %v2492_v52 = vpop.f32.mrb[19].mxu0  ;;  %v2494_v14 = vpop.f32.mrb[19].mxu1  ;;  %1435 = vst.msk [vmem:[#allocation8 + $0x80] sm:$0xf] %vm1402_vm3, %v1712_v55  ;;  %v1715_v15 = vpack.c.bf16 %v1117_v60, %v1117_v60  ;;  %v1115_v18 = vmul.f32 %v1932_v4, %v2378_v58  ;;  %1955 = vpow2.f32 %v1592_v31  ;;  %v1566_v58 = vmul.f32 -1.442695, %v2480_v61 }
 0x13b   :  { %v1934_v59 = vpop.eup %1933  ;;  %1406 = vst.msk [vmem:[#allocation8 + $0xc] sm:$0xf] %vm1402_vm3, %v1683_v7  ;;  %v1681_v57 = vpack.c.bf16 %v1083_v8, %v1083_v8  ;;  %1957 = vpow2.f32 %v1563_v42 }
 0x13c   :  { %v1936_v23 = vpop.eup %1935  ;;  %v1088_v0 = vmul.f32 %v1934_v59, %v2385_v1  ;;  %1438 = vst.msk [vmem:[#allocation8 + $0x8c] sm:$0xf] %vm1402_vm3, %v1715_v15  ;;  %v1713_v27 = vpack.c.bf16 %v1115_v18, %v1115_v18  ;;  %1959 = vpow2.f32 %v1595_v36  ;;  %v1598_v1 = vmul.f32 -1.442695, %v2490_v13  ;;  %v2512_v29 = vpop.f32.mrb[20].mxu1 }
 0x13d   :  { %v1938_v24 = vpop.eup %1937  ;;  %v1120_v30 = vmul.f32 %v1936_v23, %v2388_v2  ;;  %1404 = vst.msk [vmem:[#allocation8 + $0x4] sm:$0xf] %vm1402_vm3, %v1681_v57  ;;  %1961 = vpow2.f32 %v1561_v19  ;;  %v2510_v2 = vpop.f32.mrb[20].mxu0  ;;  %v2534_v23 = vadd.f32 %v2350_v38, %v2428_v3  ;;  %v2543_v3 = vadd.f32 %v2350_v38, %v2434_v10 }
 0x13e   :  { %v1940_v25 = vpop.eup %1939  ;;  %v1686_v33 = vpack.c.bf16 %v1088_v0, %v1088_v0  ;;  %v1086_v34 = vmul.f32 %v1938_v24, %v2391_v5  ;;  %1436 = vst.msk [vmem:[#allocation8 + $0x84] sm:$0xf] %vm1402_vm3, %v1713_v27  ;;  %1963 = vpow2.f32 %v1593_v20  ;;  %v2516_v32 = vpop.f32.mrb[21].mxu0 }
 0x13f   :  { %v1942_v31 = vpop.eup %1941  ;;  %v1718_v37 = vpack.c.bf16 %v1120_v30, %v1120_v30  ;;  %v1118_v39 = vmul.f32 %v1940_v25, %v2394_v6  ;;  %v2518_v49 = vpop.f32.mrb[21].mxu1  ;;  %1965 = vpow2.f32 %v1566_v58 }
 0x140   :  { %v1944_v43 = vpop.eup %1943  ;;  %1409 = vst.msk [vmem:[#allocation8 + $0x18] sm:$0xf] %vm1402_vm3, %v1686_v33  ;;  %v1684_v42 = vpack.c.bf16 %v1086_v34, %v1086_v34  ;;  %v1089_v5 = vmul.f32 %v1942_v31, %v2399_v11  ;;  %v2521_v46 = vpop.f32.mrb[22].mxu0  ;;  %1967 = vpow2.f32 %v1598_v1  ;;  %v1564_v1 = vmul.f32 -1.442695, %v2534_v23 }
 0x141   :  { %v1946_v45 = vpop.eup %1945  ;;  %1441 = vst.msk [vmem:[#allocation8 + $0x98] sm:$0xf] %vm1402_vm3, %v1718_v37  ;;  %v1716_v6 = vpack.c.bf16 %v1118_v39, %v1118_v39  ;;  %v929_v36 = vadd.f32 1.0, %v1944_v43  ;;  %v2523_v55 = vpop.f32.mrb[22].mxu1 }
 0x142   :  { %v1948_v60 = vpop.eup %1947  ;;  %1407 = vst.msk [vmem:[#allocation8 + $0x10] sm:$0xf] %vm1402_vm3, %v1684_v42  ;;  %v1687_v4 = vpack.c.bf16 %v1089_v5, %v1089_v5  ;;  %v895_v11 = vadd.f32 1.0, %v1946_v45  ;;  %v2526_v7 = vpop.f32.mrb[23].mxu0  ;;  %v2551_v42 = vadd.f32 %v2436_v12, %v2350_v38  ;;  %v2555_v5 = vadd.f32 %v2439_v16, %v2350_v38 }
 0x143   :  { %v2528_v8 = vpop.f32.mrb[23].mxu1  ;;  %v1950_v59 = vpop.eup %1949  ;;  %1439 = vst.msk [vmem:[#allocation8 + $0x90] sm:$0xf] %vm1402_vm3, %v1716_v6  ;;  %1969 = vrcp.f32 %v929_v36  ;;  %v927_v15 = vadd.f32 1.0, %v1948_v60  ;;  %v2563_v60 = vadd.f32 %v2350_v38, %v2441_v17 }
 0x144   :  { %v1952_v18 = vpop.eup %1951  ;;  %1410 = vst.msk [vmem:[#allocation8 + $0x1c] sm:$0xf] %vm1402_vm3, %v1687_v4  ;;  %1971 = vrcp.f32 %v895_v11  ;;  %v900_v19 = vadd.f32 1.0, %v1950_v59  ;;  %v2536_v58 = vpop.f32.mrb[24].mxu0  ;;  %v2567_v4 = vadd.f32 %v2350_v38, %v2447_v22  ;;  %v1596_v22 = vmul.f32 -1.442695, %v2543_v3 }
 0x145   :  { %v1954_v57 = vpop.eup %1953  ;;  %1973 = vrcp.f32 %v927_v15  ;;  %v932_v0 = vadd.f32 1.0, %v1952_v18  ;;  %v2538_v25 = vpop.f32.mrb[24].mxu1  ;;  %v2575_v15 = vadd.f32 %v2465_v44, %v2350_v38  ;;  %v2579_v18 = vadd.f32 %v2467_v48, %v2350_v38 }
 0x146   :  { %v1956_v20 = vpop.eup %1955  ;;  %1975 = vrcp.f32 %v900_v19  ;;  %v898_v24 = vadd.f32 1.0, %v1954_v57  ;;  %v2545_v31 = vpop.f32.mrb[25].mxu0  ;;  %v2584_v57 = vadd.f32 %v2350_v38, %v2472_v53  ;;  %v1599_v44 = vmul.f32 -1.442695, %v2555_v5 }
 0x147   :  { %v1958_v27 = vpop.eup %1957  ;;  %1977 = vrcp.f32 %v932_v0  ;;  %v930_v30 = vadd.f32 1.0, %v1956_v20  ;;  %v2547_v37 = vpop.f32.mrb[25].mxu1  ;;  %v1570_v53 = vmul.f32 -1.442695, %v2575_v15 }
 0x148   :  { %v1960_v33 = vpop.eup %1959  ;;  %1979 = vrcp.f32 %v898_v24  ;;  %v901_v34 = vadd.f32 1.0, %v1958_v27  ;;  %v2557_v45 = vpop.f32.mrb[26].mxu0  ;;  %v1567_v24 = vmul.f32 -1.442695, %v2551_v42 }
 0x149   :  { %v1962_v39 = vpop.eup %1961  ;;  %1981 = vrcp.f32 %v930_v30  ;;  %v933_v43 = vadd.f32 1.0, %v1960_v33  ;;  %v2559_v6 = vpop.f32.mrb[26].mxu1  ;;  %v1565_v30 = vmul.f32 -1.442695, %v2563_v60  ;;  %v1597_v33 = vmul.f32 -1.442695, %v2567_v4 }
 0x14a   :  { %v1964_v10 = vpop.eup %1963  ;;  %1983 = vrcp.f32 %v901_v34  ;;  %v899_v36 = vadd.f32 1.0, %v1962_v39  ;;  %v2569_v12 = vpop.f32.mrb[27].mxu0 }
 0x14b   :  { %v2571_v11 = vpop.f32.mrb[27].mxu1  ;;  %v1966_v16 = vpop.eup %1965  ;;  %1985 = vrcp.f32 %v933_v43  ;;  %v931_v59 = vadd.f32 1.0, %v1964_v10  ;;  %v1602_v43 = vmul.f32 -1.442695, %v2579_v18 }
 0x14c   :  { %v1968_v17 = vpop.eup %1967  ;;  %1987 = vrcp.f32 %v899_v36  ;;  %v904_v19 = vadd.f32 1.0, %v1966_v16  ;;  %v2594_v10 = vpop.f32.mrb[28].mxu0 }
 0x14d   :  { %v1970_v0 = vpop.eup %1969  ;;  %1989 = vrcp.f32 %v931_v59  ;;  %v936_v20 = vadd.f32 1.0, %v1968_v17  ;;  %2863 = vst [vmem:[#allocation12_spill] sm:$0xff] %v2594_v10  ;;  %v2596_v36 = vpop.f32.mrb[28].mxu1  ;;  %v1568_v17 = vmul.f32 -1.442695, %v2584_v57  ;;  %v2607_v10 = vadd.f32 %v2350_v38, %v2474_v54 }
 0x14e   :  { %v1972_v27 = vpop.eup %1971  ;;  %v1121_v48 = vmul.f32 %v1970_v0, %v2405_v35  ;;  %1991 = vrcp.f32 %v904_v19  ;;  %2864 = vst [vmem:[#allocation13_spill] sm:$0xff] %v2596_v36  ;;  %v2600_v19 = vpop.f32.mrb[29].mxu0 }
 0x14f   :  { %v1974_v34 = vpop.eup %1973  ;;  %v1087_v39 = vmul.f32 %v1972_v27, %v2408_v40  ;;  %1993 = vrcp.f32 %v936_v20  ;;  %v2602_v0 = vpop.f32.mrb[29].mxu1 }
 0x150   :  { %v1976_v16 = vpop.eup %1975  ;;  %v1719_v59 = vpack.c.bf16 %v1121_v48, %v1121_v48  ;;  %v1119_v35 = vmul.f32 %v1974_v34, %v2411_v47  ;;  %1995 = vpow2.f32 %v1564_v1  ;;  %v2609_v36 = vpop.f32.mrb[30].mxu0 }
 0x151   :  { %v1978_v40 = vpop.eup %1977  ;;  %v1685_v20 = vpack.c.bf16 %v1087_v39, %v1087_v39  ;;  %v1092_v27 = vmul.f32 %v1976_v16, %v2414_v50  ;;  %1997 = vpow2.f32 %v1596_v22  ;;  %v2611_v48 = vpop.f32.mrb[30].mxu1  ;;  %v2617_v39 = vadd.f32 %v2482_v62, %v2350_v38 }
 0x152   :  { %2865 = vst [vmem:[#allocation14_spill] sm:$0xff] %v2611_v48  ;;  %v1980_v47 = vpop.eup %1979  ;;  %1442 = vst.msk [vmem:[#allocation8 + $0x9c] sm:$0xf] %vm1402_vm3, %v1719_v59  ;;  %v1717_v1 = vpack.c.bf16 %v1119_v35, %v1119_v35  ;;  %v1124_v34 = vmul.f32 %v1978_v40, %v2418_v56  ;;  %1999 = vpow2.f32 %v1567_v24  ;;  %v2619_v50 = vpop.f32.mrb[31].mxu0  ;;  %v2627_v59 = vadd.f32 %v2484_v51, %v2350_v38 }
 0x153   :  { %v2621_v22 = vpop.f32.mrb[31].mxu1  ;;  %v1982_v54 = vpop.eup %1981  ;;  %1408 = vst.msk [vmem:[#allocation8 + $0x14] sm:$0xf] %vm1402_vm3, %v1685_v20  ;;  %v1690_v16 = vpack.c.bf16 %v1092_v27, %v1092_v27  ;;  %v1090_v48 = vmul.f32 %v1980_v47, %v2424_v63  ;;  %2001 = vpow2.f32 %v1599_v44  ;;  %v2633_v35 = vadd.f32 %v2350_v38, %v2492_v52 }
 0x154   :  { %v1984_v56 = vpop.eup %1983  ;;  %1440 = vst.msk [vmem:[#allocation8 + $0x94] sm:$0xf] %vm1402_vm3, %v1717_v1  ;;  %v1722_v62 = vpack.c.bf16 %v1124_v34, %v1124_v34  ;;  %v1122_v24 = vmul.f32 %v1982_v54, %v2432_v9  ;;  %2003 = vpow2.f32 %v1565_v30  ;;  %v1600_v51 = vmul.f32 -1.442695, %v2607_v10 }
 0x155   :  { %v1986_v40 = vpop.eup %1985  ;;  %1413 = vst.msk [vmem:[#allocation8 + $0x28] sm:$0xf] %vm1402_vm3, %v1690_v16  ;;  %v1688_v63 = vpack.c.bf16 %v1090_v48, %v1090_v48  ;;  %v1093_v44 = vmul.f32 %v1984_v56, %v2445_v21  ;;  %2005 = vpow2.f32 %v1597_v33  ;;  %v1571_v30 = vmul.f32 -1.442695, %v2617_v39 }
 0x156   :  { %v1988_v20 = vpop.eup %1987  ;;  %1445 = vst.msk [vmem:[#allocation8 + $0xa8] sm:$0xf] %vm1402_vm3, %v1722_v62  ;;  %v1720_v27 = vpack.c.bf16 %v1122_v24, %v1122_v24  ;;  %v1125_v9 = vmul.f32 %v1986_v40, %v2452_v26  ;;  %2007 = vpow2.f32 %v1570_v53  ;;  %v1603_v21 = vmul.f32 -1.442695, %v2627_v59 }
 0x157   :  { %v1990_v52 = vpop.eup %1989  ;;  %1411 = vst.msk [vmem:[#allocation8 + $0x20] sm:$0xf] %vm1402_vm3, %v1688_v63  ;;  %v1691_v47 = vpack.c.bf16 %v1093_v44, %v1093_v44  ;;  %v1091_v48 = vmul.f32 %v1988_v20, %v2457_v28  ;;  %2009 = vpow2.f32 %v1602_v43  ;;  %v1569_v26 = vmul.f32 -1.442695, %v2633_v35 }
 0x158   :  { %v1992_v33 = vpop.eup %1991  ;;  %1443 = vst.msk [vmem:[#allocation8 + $0xa0] sm:$0xf] %vm1402_vm3, %v1720_v27  ;;  %v1723_v1 = vpack.c.bf16 %v1125_v9, %v1125_v9  ;;  %v1123_v34 = vmul.f32 %v1990_v52, %v2461_v41  ;;  %2011 = vpow2.f32 %v1568_v17  ;;  %v2657_v9 = vadd.f32 %v2350_v38, %v2494_v14 }
 0x159   :  { %v1994_v53 = vpop.eup %1993  ;;  %1414 = vst.msk [vmem:[#allocation8 + $0x2c] sm:$0xf] %vm1402_vm3, %v1691_v47  ;;  %v1689_v54 = vpack.c.bf16 %v1091_v48, %v1091_v48  ;;  %v1096_v16 = vmul.f32 %v1992_v33, %v2480_v61  ;;  %2013 = vpow2.f32 %v1600_v51 }
 0x15a   :  { %v1996_v28 = vpop.eup %1995  ;;  %1446 = vst.msk [vmem:[#allocation8 + $0xac] sm:$0xf] %vm1402_vm3, %v1723_v1  ;;  %v1721_v43 = vpack.c.bf16 %v1123_v34, %v1123_v34  ;;  %v1128_v56 = vmul.f32 %v1994_v53, %v2490_v13  ;;  %2015 = vpow2.f32 %v1571_v30  ;;  %v2661_v1 = vadd.f32 %v2510_v2, %v2350_v38 }
 0x15b   :  { %v1998_v62 = vpop.eup %1997  ;;  %1412 = vst.msk [vmem:[#allocation8 + $0x24] sm:$0xf] %vm1402_vm3, %v1689_v54  ;;  %v1694_v41 = vpack.c.bf16 %v1096_v16, %v1096_v16  ;;  %v902_v17 = vadd.f32 1.0, %v1996_v28  ;;  %2017 = vpow2.f32 %v1603_v21  ;;  %v2665_v34 = vadd.f32 %v2512_v29, %v2350_v38 }
 0x15c   :  { %v2000_v24 = vpop.eup %1999  ;;  %1444 = vst.msk [vmem:[#allocation8 + $0xa4] sm:$0xf] %vm1402_vm3, %v1721_v43  ;;  %v1726_v40 = vpack.c.bf16 %v1128_v56, %v1128_v56  ;;  %v934_v63 = vadd.f32 1.0, %v1998_v62  ;;  %2019 = vpow2.f32 %v1569_v26  ;;  %v1601_v53 = vmul.f32 -1.442695, %v2657_v9 }
 0x15d   :  { %v2002_v61 = vpop.eup %2001  ;;  %1417 = vst.msk [vmem:[#allocation8 + $0x38] sm:$0xf] %vm1402_vm3, %v1694_v41  ;;  %2021 = vrcp.f32 %v902_v17  ;;  %v905_v44 = vadd.f32 1.0, %v2000_v24  ;;  %v2670_v54 = vadd.f32 %v2350_v38, %v2516_v32  ;;  %v2674_v2 = vadd.f32 %v2350_v38, %v2518_v49 }
 0x15e   :  { %v2004_v51 = vpop.eup %2003  ;;  %1449 = vst.msk [vmem:[#allocation8 + $0xb8] sm:$0xf] %vm1402_vm3, %v1726_v40  ;;  %2023 = vrcp.f32 %v934_v63  ;;  %v937_v13 = vadd.f32 1.0, %v2002_v61  ;;  %v2678_v29 = vadd.f32 %v2521_v46, %v2350_v38  ;;  %v2682_v62 = vadd.f32 %v2523_v55, %v2350_v38 }
 0x15f   :  { %v2006_v20 = vpop.eup %2005  ;;  %2025 = vrcp.f32 %v905_v44  ;;  %v903_v27 = vadd.f32 1.0, %v2004_v51  ;;  %v2686_v32 = vadd.f32 %v2350_v38, %v2526_v7  ;;  %v1574_v49 = vmul.f32 -1.442695, %v2661_v1 }
 0x160   :  { %v2008_v30 = vpop.eup %2007  ;;  %2027 = vrcp.f32 %v937_v13  ;;  %v935_v52 = vadd.f32 1.0, %v2006_v20  ;;  %v1606_v24 = vmul.f32 -1.442695, %v2665_v34  ;;  %v1572_v63 = vmul.f32 -1.442695, %v2670_v54 }
 0x161   :  { %v2010_v47 = vpop.eup %2009  ;;  %2029 = vrcp.f32 %v903_v27  ;;  %v908_v48 = vadd.f32 1.0, %v2008_v30  ;;  %v2693_v55 = vadd.f32 %v2350_v38, %v2528_v8  ;;  %v1604_v44 = vmul.f32 -1.442695, %v2674_v2 }
 0x162   :  { %v2012_v21 = vpop.eup %2011  ;;  %2031 = vrcp.f32 %v935_v52  ;;  %v940_v33 = vadd.f32 1.0, %v2010_v47  ;;  %v1575_v51 = vmul.f32 -1.442695, %v2678_v29  ;;  %v1607_v27 = vmul.f32 -1.442695, %v2682_v62 }
 0x163   :  { %v2014_v26 = vpop.eup %2013  ;;  %2033 = vrcp.f32 %v908_v48  ;;  %v906_v14 = vadd.f32 1.0, %v2012_v21  ;;  %v1573_v30 = vmul.f32 -1.442695, %v2686_v32 }
 0x164   :  { %v2016_v16 = vpop.eup %2015  ;;  %2035 = vrcp.f32 %v940_v33  ;;  %v938_v28 = vadd.f32 1.0, %v2014_v26 }
 0x165   :  { %v2018_v43 = vpop.eup %2017  ;;  %2037 = vrcp.f32 %v906_v14  ;;  %v909_v56 = vadd.f32 1.0, %v2016_v16 }
 0x166   :  { %v2020_v41 = vpop.eup %2019  ;;  %2039 = vrcp.f32 %v938_v28  ;;  %v941_v17 = vadd.f32 1.0, %v2018_v43  ;;  %v2718_v28 = vadd.f32 %v2350_v38, %v2545_v31 }
 0x167   :  { %v2022_v46 = vpop.eup %2021  ;;  %2041 = vrcp.f32 %v909_v56  ;;  %v907_v40 = vadd.f32 1.0, %v2020_v41 }
 0x168   :  { %v2024_v61 = vpop.eup %2023  ;;  %v1094_v7 = vmul.f32 %v2022_v46, %v2534_v23  ;;  %2043 = vrcp.f32 %v941_v17  ;;  %v2704_v23 = vadd.f32 %v2536_v58, %v2350_v38 }
 0x169   :  { %v2026_v13 = vpop.eup %2025  ;;  %v1126_v20 = vmul.f32 %v2024_v61, %v2543_v3  ;;  %2045 = vrcp.f32 %v907_v40  ;;  %v1605_v3 = vmul.f32 -1.442695, %v2693_v55 }
 0x16a   :  { %v2028_v52 = vpop.eup %2027  ;;  %v1692_v47 = vpack.c.bf16 %v1094_v7, %v1094_v7  ;;  %v1097_v8 = vmul.f32 %v2026_v13, %v2551_v42  ;;  %2047 = vpow2.f32 %v1601_v53  ;;  %v2712_v42 = vadd.f32 %v2538_v25, %v2350_v38 }
 0x16b   :  { %v2030_v48 = vpop.eup %2029  ;;  %v1724_v21 = vpack.c.bf16 %v1126_v20, %v1126_v20  ;;  %v1129_v33 = vmul.f32 %v2028_v52, %v2555_v5  ;;  %2049 = vpow2.f32 %v1574_v49  ;;  %v2724_v25 = vadd.f32 %v2350_v38, %v2547_v37 }
 0x16c   :  { %v2032_v26 = vpop.eup %2031  ;;  %1415 = vst.msk [vmem:[#allocation8 + $0x30] sm:$0xf] %vm1402_vm3, %v1692_v47  ;;  %v1695_v14 = vpack.c.bf16 %v1097_v8, %v1097_v8  ;;  %v1095_v16 = vmul.f32 %v2030_v48, %v2563_v60  ;;  %2051 = vpow2.f32 %v1606_v24  ;;  %v1578_v31 = vmul.f32 -1.442695, %v2704_v23 }
 0x16d   :  { %v2034_v58 = vpop.eup %2033  ;;  %1447 = vst.msk [vmem:[#allocation8 + $0xb0] sm:$0xf] %vm1402_vm3, %v1724_v21  ;;  %v1727_v53 = vpack.c.bf16 %v1129_v33, %v1129_v33  ;;  %v1127_v5 = vmul.f32 %v2032_v26, %v2567_v4  ;;  %2053 = vpow2.f32 %v1572_v63  ;;  %v1610_v46 = vmul.f32 -1.442695, %v2712_v42 }
 0x16e   :  { %v2036_v43 = vpop.eup %2035  ;;  %1418 = vst.msk [vmem:[#allocation8 + $0x3c] sm:$0xf] %vm1402_vm3, %v1695_v14  ;;  %v1693_v60 = vpack.c.bf16 %v1095_v16, %v1095_v16  ;;  %v1100_v56 = vmul.f32 %v2034_v58, %v2575_v15  ;;  %2055 = vpow2.f32 %v1604_v44 }
 0x16f   :  { %v2038_v41 = vpop.eup %2037  ;;  %1450 = vst.msk [vmem:[#allocation8 + $0xbc] sm:$0xf] %vm1402_vm3, %v1727_v53  ;;  %v1725_v4 = vpack.c.bf16 %v1127_v5, %v1127_v5  ;;  %v1132_v17 = vmul.f32 %v2036_v43, %v2579_v18  ;;  %2057 = vpow2.f32 %v1575_v51  ;;  %v1576_v18 = vmul.f32 -1.442695, %v2718_v28 }
 0x170   :  { %v2040_v49 = vpop.eup %2039  ;;  %1416 = vst.msk [vmem:[#allocation8 + $0x34] sm:$0xf] %vm1402_vm3, %v1693_v60  ;;  %v1698_v24 = vpack.c.bf16 %v1100_v56, %v1100_v56  ;;  %v1098_v15 = vmul.f32 %v2038_v41, %v2584_v57  ;;  %2059 = vpow2.f32 %v1607_v27  ;;  %v1608_v57 = vmul.f32 -1.442695, %v2724_v25  ;;  %v2147_v60 = vld [vmem:[#allocation7] ss:$0 sm:$0xff] }
 0x171   :  { %v2042_v38 = vpop.eup %2041  ;;  %1448 = vst.msk [vmem:[#allocation8 + $0xb4] sm:$0xf] %vm1402_vm3, %v1725_v4  ;;  %v1730_v37 = vpack.c.bf16 %v1132_v17, %v1132_v17  ;;  %v1130_v40 = vmul.f32 %v2040_v49, %v2607_v10  ;;  %2061 = vpow2.f32 %v1573_v30  ;;  %v2747_v56 = vadd.f32 %v2147_v60, %v2557_v45  ;;  %v2867_v45 = vld [vmem:[#allocation13_spill] sm:$0xff] }
 0x172   :  { %v2044_v63 = vpop.eup %2043  ;;  %1421 = vst.msk [vmem:[#allocation8 + $0x48] sm:$0xf] %vm1402_vm3, %v1698_v24  ;;  %v1696_v61 = vpack.c.bf16 %v1098_v15, %v1098_v15  ;;  %v1101_v7 = vmul.f32 %v2042_v38, %v2617_v39  ;;  %2063 = vpow2.f32 %v1605_v3  ;;  %v2750_v41 = vadd.f32 %v2147_v60, %v2559_v6 }
 0x173   :  { %v2046_v44 = vpop.eup %2045  ;;  %1453 = vst.msk [vmem:[#allocation8 + $0xc8] sm:$0xf] %vm1402_vm3, %v1730_v37  ;;  %v1728_v51 = vpack.c.bf16 %v1130_v40, %v1130_v40  ;;  %v1133_v13 = vmul.f32 %v2044_v63, %v2627_v59  ;;  %2065 = vpow2.f32 %v1578_v31  ;;  %v2753_v31 = vadd.f32 %v2147_v60, %v2569_v12 }
 0x174   :  { %v2048_v10 = vpop.eup %2047  ;;  %1419 = vst.msk [vmem:[#allocation8 + $0x40] sm:$0xf] %vm1402_vm3, %v1696_v61  ;;  %v1699_v20 = vpack.c.bf16 %v1101_v7, %v1101_v7  ;;  %v1099_v27 = vmul.f32 %v2046_v44, %v2633_v35  ;;  %2067 = vpow2.f32 %v1610_v46  ;;  %v2756_v49 = vadd.f32 %v2147_v60, %v2571_v11  ;;  %v2866_v46 = vld [vmem:[#allocation12_spill] sm:$0xff] }
 0x175   :  { %v2050_v30 = vpop.eup %2049  ;;  %1451 = vst.msk [vmem:[#allocation8 + $0xc0] sm:$0xf] %vm1402_vm3, %v1728_v51  ;;  %v1731_v39 = vpack.c.bf16 %v1133_v13, %v1133_v13  ;;  %v939_v52 = vadd.f32 1.0, %v2048_v10  ;;  %2069 = vpow2.f32 %v1576_v18  ;;  %v2759_v38 = vadd.f32 %v2147_v60, %v2866_v46 }
 0x176   :  { %v2052_v47 = vpop.eup %2051  ;;  %1422 = vst.msk [vmem:[#allocation8 + $0x4c] sm:$0xf] %vm1402_vm3, %v1699_v20  ;;  %v1697_v8 = vpack.c.bf16 %v1099_v27, %v1099_v27  ;;  %v912_v48 = vadd.f32 1.0, %v2050_v30  ;;  %2071 = vpow2.f32 %v1608_v57  ;;  %v2762_v37 = vadd.f32 %v2147_v60, %v2867_v45 }
 0x177   :  { %v2054_v59 = vpop.eup %2053  ;;  %1454 = vst.msk [vmem:[#allocation8 + $0xcc] sm:$0xf] %vm1402_vm3, %v1731_v39  ;;  %2073 = vrcp.f32 %v939_v52  ;;  %v944_v21 = vadd.f32 1.0, %v2052_v47  ;;  %v2765_v18 = vadd.f32 %v2147_v60, %v2600_v19  ;;  %v2768_v12 = vadd.f32 %v2147_v60, %v2602_v0 }
 0x178   :  { %v2056_v33 = vpop.eup %2055  ;;  %1420 = vst.msk [vmem:[#allocation8 + $0x44] sm:$0xf] %vm1402_vm3, %v1697_v8  ;;  %2075 = vrcp.f32 %v912_v48  ;;  %v910_v35 = vadd.f32 1.0, %v2054_v59  ;;  %v1579_v61 = vmul.f32 -1.442695, %v2747_v56 }
 0x179   :  { %v2058_v3 = vpop.eup %2057  ;;  %2077 = vrcp.f32 %v944_v21  ;;  %v942_v26 = vadd.f32 1.0, %v2056_v33  ;;  %v1611_v7 = vmul.f32 -1.442695, %v2750_v41  ;;  %v1577_v51 = vmul.f32 -1.442695, %v2753_v31 }
 0x17a   :  { %v2060_v14 = vpop.eup %2059  ;;  %2079 = vrcp.f32 %v910_v35  ;;  %v913_v16 = vadd.f32 1.0, %v2058_v3  ;;  %v1609_v13 = vmul.f32 -1.442695, %v2756_v49  ;;  %v1582_v0 = vmul.f32 -1.442695, %v2759_v38  ;;  %v2868_v35 = vld [vmem:[#allocation14_spill] sm:$0xff] }
 0x17b   :  { %v2062_v58 = vpop.eup %2061  ;;  %2081 = vrcp.f32 %v942_v26  ;;  %v945_v53 = vadd.f32 1.0, %v2060_v14  ;;  %v1614_v20 = vmul.f32 -1.442695, %v2762_v37  ;;  %v1580_v39 = vmul.f32 -1.442695, %v2765_v18 }
 0x17c   :  { %v2064_v5 = vpop.eup %2063  ;;  %2083 = vrcp.f32 %v913_v16  ;;  %v911_v43 = vadd.f32 1.0, %v2062_v58  ;;  %v1612_v52 = vmul.f32 -1.442695, %v2768_v12  ;;  %v2796_v58 = vadd.f32 %v2147_v60, %v2621_v22 }
 0x17d   :  { %v2066_v4 = vpop.eup %2065  ;;  %2085 = vrcp.f32 %v945_v53  ;;  %v943_v17 = vadd.f32 1.0, %v2064_v5 }
 0x17e   :  { %v2068_v24 = vpop.eup %2067  ;;  %2087 = vrcp.f32 %v911_v43  ;;  %v916_v15 = vadd.f32 1.0, %v2066_v4 }
 0x17f   :  { %v2070_v6 = vpop.eup %2069  ;;  %2089 = vrcp.f32 %v943_v17  ;;  %v948_v40 = vadd.f32 1.0, %v2068_v24 }
 0x180   :  { %v2072_v11 = vpop.eup %2071  ;;  %2091 = vrcp.f32 %v916_v15  ;;  %v914_v63 = vadd.f32 1.0, %v2070_v6 }
 0x181   :  { %v2074_v57 = vpop.eup %2073  ;;  %2093 = vrcp.f32 %v948_v40  ;;  %v946_v44 = vadd.f32 1.0, %v2072_v11 }
 0x182   :  { %v2076_v10 = vpop.eup %2075  ;;  %v1131_v19 = vmul.f32 %v2074_v57, %v2657_v9  ;;  %2095 = vrcp.f32 %v914_v63  ;;  %v2782_v9 = vadd.f32 %v2147_v60, %v2609_v36 }
 0x183   :  { %v2078_v27 = vpop.eup %2077  ;;  %v1104_v30 = vmul.f32 %v2076_v10, %v2661_v1  ;;  %2097 = vrcp.f32 %v946_v44  ;;  %v2786_v1 = vadd.f32 %v2147_v60, %v2868_v35 }
 0x184   :  { %v2080_v47 = vpop.eup %2079  ;;  %v1729_v8 = vpack.c.bf16 %v1131_v19, %v1131_v19  ;;  %v1136_v48 = vmul.f32 %v2078_v27, %v2665_v34  ;;  %2099 = vpow2.f32 %v1579_v61  ;;  %v2791_v34 = vadd.f32 %v2147_v60, %v2619_v50 }
 0x185   :  { %v2082_v59 = vpop.eup %2081  ;;  %v1702_v21 = vpack.c.bf16 %v1104_v30, %v1104_v30  ;;  %v1102_v33 = vmul.f32 %v2080_v47, %v2670_v54  ;;  %2101 = vpow2.f32 %v1611_v7  ;;  %v1583_v50 = vmul.f32 -1.442695, %v2782_v9 }
 0x186   :  { %v2084_v3 = vpop.eup %2083  ;;  %1452 = vst.msk [vmem:[#allocation8 + $0xc4] sm:$0xf] %vm1402_vm3, %v1729_v8  ;;  %v1734_v26 = vpack.c.bf16 %v1136_v48, %v1136_v48  ;;  %v1134_v14 = vmul.f32 %v2082_v59, %v2674_v2  ;;  %2103 = vpow2.f32 %v1577_v51 }
 0x187   :  { %v2086_v36 = vpop.eup %2085  ;;  %1425 = vst.msk [vmem:[#allocation8 + $0x58] sm:$0xf] %vm1402_vm3, %v1702_v21  ;;  %v1700_v16 = vpack.c.bf16 %v1102_v33, %v1102_v33  ;;  %v1105_v54 = vmul.f32 %v2084_v3, %v2678_v29  ;;  %2105 = vpow2.f32 %v1609_v13  ;;  %v1615_v29 = vmul.f32 -1.442695, %v2786_v1 }
 0x188   :  { %v2088_v53 = vpop.eup %2087  ;;  %1457 = vst.msk [vmem:[#allocation8 + $0xd8] sm:$0xf] %vm1402_vm3, %v1734_v26  ;;  %v1732_v5 = vpack.c.bf16 %v1134_v14, %v1134_v14  ;;  %v1137_v2 = vmul.f32 %v2086_v36, %v2682_v62  ;;  %2107 = vpow2.f32 %v1582_v0  ;;  %v1581_v62 = vmul.f32 -1.442695, %v2791_v34 }
 0x189   :  { %v2090_v43 = vpop.eup %2089  ;;  %1423 = vst.msk [vmem:[#allocation8 + $0x50] sm:$0xf] %vm1402_vm3, %v1700_v16  ;;  %v1703_v4 = vpack.c.bf16 %v1105_v54, %v1105_v54  ;;  %v1103_v17 = vmul.f32 %v2088_v53, %v2686_v32  ;;  %2109 = vpow2.f32 %v1614_v20  ;;  %v1613_v32 = vmul.f32 -1.442695, %v2796_v58 }
 0x18a   :  { %v2092_v22 = vpop.eup %2091  ;;  %1455 = vst.msk [vmem:[#allocation8 + $0xd0] sm:$0xf] %vm1402_vm3, %v1732_v5  ;;  %v1735_v60 = vpack.c.bf16 %v1137_v2, %v1137_v2  ;;  %v1135_v24 = vmul.f32 %v2090_v43, %v2693_v55  ;;  %2111 = vpow2.f32 %v1580_v39 }
 0x18b   :  { %v2094_v15 = vpop.eup %2093  ;;  %1426 = vst.msk [vmem:[#allocation8 + $0x5c] sm:$0xf] %vm1402_vm3, %v1703_v4  ;;  %v1701_v46 = vpack.c.bf16 %v1103_v17, %v1103_v17  ;;  %v1108_v45 = vmul.f32 %v2092_v22, %v2704_v23  ;;  %2113 = vpow2.f32 %v1612_v52 }
 0x18c   :  { %v2096_v6 = vpop.eup %2095  ;;  %1458 = vst.msk [vmem:[#allocation8 + $0xdc] sm:$0xf] %vm1402_vm3, %v1735_v60  ;;  %v1733_v40 = vpack.c.bf16 %v1135_v24, %v1135_v24  ;;  %v1140_v11 = vmul.f32 %v2094_v15, %v2712_v42  ;;  %2115 = vpow2.f32 %v1583_v50 }
 0x18d   :  { %v2098_v55 = vpop.eup %2097  ;;  %1424 = vst.msk [vmem:[#allocation8 + $0x54] sm:$0xf] %vm1402_vm3, %v1701_v46  ;;  %v1706_v63 = vpack.c.bf16 %v1108_v45, %v1108_v45  ;;  %v1106_v61 = vmul.f32 %v2096_v6, %v2718_v28  ;;  %2117 = vpow2.f32 %v1615_v29 }
 0x18e   :  { %v2100_v7 = vpop.eup %2099  ;;  %1456 = vst.msk [vmem:[#allocation8 + $0xd4] sm:$0xf] %vm1402_vm3, %v1733_v40  ;;  %v1738_v23 = vpack.c.bf16 %v1140_v11, %v1140_v11  ;;  %v1138_v57 = vmul.f32 %v2098_v55, %v2724_v25  ;;  %2119 = vpow2.f32 %v1581_v62 }
 0x18f   :  { %v2102_v44 = vpop.eup %2101  ;;  %1429 = vst.msk [vmem:[#allocation8 + $0x68] sm:$0xf] %vm1402_vm3, %v1706_v63  ;;  %v1704_v51 = vpack.c.bf16 %v1106_v61, %v1106_v61  ;;  %v917_v42 = vadd.f32 1.0, %v2100_v7  ;;  %2121 = vpow2.f32 %v1613_v32 }
 0x190   :  { %v2104_v13 = vpop.eup %2103  ;;  %1461 = vst.msk [vmem:[#allocation8 + $0xe8] sm:$0xf] %vm1402_vm3, %v1738_v23  ;;  %v1736_v10 = vpack.c.bf16 %v1138_v57, %v1138_v57  ;;  %v949_v19 = vadd.f32 1.0, %v2102_v44 }
 0x191   :  { %v2106_v28 = vpop.eup %2105  ;;  %1427 = vst.msk [vmem:[#allocation8 + $0x60] sm:$0xf] %vm1402_vm3, %v1704_v51  ;;  %2123 = vrcp.f32 %v917_v42  ;;  %v915_v0 = vadd.f32 1.0, %v2104_v13 }
 0x192   :  { %v2108_v20 = vpop.eup %2107  ;;  %1459 = vst.msk [vmem:[#allocation8 + $0xe0] sm:$0xf] %vm1402_vm3, %v1736_v10  ;;  %2125 = vrcp.f32 %v949_v19  ;;  %v947_v25 = vadd.f32 1.0, %v2106_v28 }
 0x193   :  { %v2110_v27 = vpop.eup %2109  ;;  %2127 = vrcp.f32 %v915_v0  ;;  %v920_v30 = vadd.f32 1.0, %v2108_v20 }
 0x194   :  { %v2112_v39 = vpop.eup %2111  ;;  %2129 = vrcp.f32 %v947_v25  ;;  %v952_v52 = vadd.f32 1.0, %v2110_v27 }
 0x195   :  { %v2114_v47 = vpop.eup %2113  ;;  %2131 = vrcp.f32 %v920_v30  ;;  %v918_v8 = vadd.f32 1.0, %v2112_v39 }
 0x196   :  { %v2116_v48 = vpop.eup %2115  ;;  %2133 = vrcp.f32 %v952_v52  ;;  %v950_v59 = vadd.f32 1.0, %v2114_v47 }
 0x197   :  { %v2118_v21 = vpop.eup %2117  ;;  %2135 = vrcp.f32 %v918_v8  ;;  %v921_v33 = vadd.f32 1.0, %v2116_v48 }
 0x198   :  { %v2120_v35 = vpop.eup %2119  ;;  %2137 = vrcp.f32 %v950_v59  ;;  %v953_v3 = vadd.f32 1.0, %v2118_v21 }
 0x199   :  { %v2122_v26 = vpop.eup %2121  ;;  %2139 = vrcp.f32 %v921_v33  ;;  %v919_v14 = vadd.f32 1.0, %v2120_v35 }
 0x19a   :  { %2141 = vrcp.f32 %v953_v3  ;;  %v951_v36 = vadd.f32 1.0, %v2122_v26 }
 0x19b   :  { %v2124_v16 = vpop.eup %2123  ;;  %2143 = vrcp.f32 %v919_v14 }
 0x19c   :  { %v2126_v54 = vpop.eup %2125  ;;  %v1109_v53 = vmul.f32 %v2124_v16, %v2747_v56  ;;  %2145 = vrcp.f32 %v951_v36 }
 0x19d   :  { %v2128_v5 = vpop.eup %2127  ;;  %v1141_v2 = vmul.f32 %v2126_v54, %v2750_v41 }
 0x19e   :  { %v2130_v50 = vpop.eup %2129  ;;  %v1707_v43 = vpack.c.bf16 %v1109_v53, %v1109_v53  ;;  %v1107_v4 = vmul.f32 %v2128_v5, %v2753_v31 }
 0x19f   :  { %v2132_v17 = vpop.eup %2131  ;;  %v1739_v29 = vpack.c.bf16 %v1141_v2, %v1141_v2  ;;  %v1139_v22 = vmul.f32 %v2130_v50, %v2756_v49 }
 0x1a0   :  { %v2134_v60 = vpop.eup %2133  ;;  %1430 = vst.msk [vmem:[#allocation8 + $0x6c] sm:$0xf] %vm1402_vm3, %v1707_v43  ;;  %v1705_v24 = vpack.c.bf16 %v1107_v4, %v1107_v4  ;;  %v1112_v62 = vmul.f32 %v2132_v17, %v2759_v38 }
 0x1a1   :  { %v2136_v15 = vpop.eup %2135  ;;  %1462 = vst.msk [vmem:[#allocation8 + $0xec] sm:$0xf] %vm1402_vm3, %v1739_v29  ;;  %v1737_v56 = vpack.c.bf16 %v1139_v22, %v1139_v22  ;;  %v1144_v41 = vmul.f32 %v2134_v60, %v2762_v37 }
 0x1a2   :  { %v2138_v46 = vpop.eup %2137  ;;  %1428 = vst.msk [vmem:[#allocation8 + $0x64] sm:$0xf] %vm1402_vm3, %v1705_v24  ;;  %v1710_v31 = vpack.c.bf16 %v1112_v62, %v1112_v62  ;;  %v1110_v45 = vmul.f32 %v2136_v15, %v2765_v18 }
 0x1a3   :  { %v2140_v32 = vpop.eup %2139  ;;  %1460 = vst.msk [vmem:[#allocation8 + $0xe4] sm:$0xf] %vm1402_vm3, %v1737_v56  ;;  %v1742_v49 = vpack.c.bf16 %v1144_v41, %v1144_v41  ;;  %v1142_v6 = vmul.f32 %v2138_v46, %v2768_v12 }
 0x1a4   :  { %v2142_v40 = vpop.eup %2141  ;;  %1433 = vst.msk [vmem:[#allocation8 + $0x78] sm:$0xf] %vm1402_vm3, %v1710_v31  ;;  %v1708_v38 = vpack.c.bf16 %v1110_v45, %v1110_v45  ;;  %v1113_v11 = vmul.f32 %v2140_v32, %v2782_v9 }
 0x1a5   :  { %v2144_v55 = vpop.eup %2143  ;;  %1465 = vst.msk [vmem:[#allocation8 + $0xf8] sm:$0xf] %vm1402_vm3, %v1742_v49  ;;  %v1740_v37 = vpack.c.bf16 %v1142_v6, %v1142_v6  ;;  %v1145_v63 = vmul.f32 %v2142_v40, %v2786_v1 }
 0x1a6   :  { %v2146_v61 = vpop.eup %2145  ;;  %1431 = vst.msk [vmem:[#allocation8 + $0x70] sm:$0xf] %vm1402_vm3, %v1708_v38  ;;  %v1711_v18 = vpack.c.bf16 %v1113_v11, %v1113_v11  ;;  %v1111_v7 = vmul.f32 %v2144_v55, %v2791_v34 }
 0x1a7   :  { %1463 = vst.msk [vmem:[#allocation8 + $0xf0] sm:$0xf] %vm1402_vm3, %v1740_v37  ;;  %v1743_v12 = vpack.c.bf16 %v1145_v63, %v1145_v63  ;;  %v1143_v23 = vmul.f32 %v2146_v61, %v2796_v58 }
 0x1a8   :  { %1434 = vst.msk [vmem:[#allocation8 + $0x7c] sm:$0xf] %vm1402_vm3, %v1711_v18  ;;  %v1709_v9 = vpack.c.bf16 %v1111_v7, %v1111_v7 }
 0x1a9   :  { %1466 = vst.msk [vmem:[#allocation8 + $0xfc] sm:$0xf] %vm1402_vm3, %v1743_v12  ;;  %v1741_v57 = vpack.c.bf16 %v1143_v23, %v1143_v23 }
 0x1aa   :  { %1432 = vst.msk [vmem:[#allocation8 + $0x74] sm:$0xf] %vm1402_vm3, %v1709_v9 }
 0x1ab   :  { %1464 = vst.msk [vmem:[#allocation8 + $0xf4] sm:$0xf] %vm1402_vm3, %v1741_v57 }
 0x1ac   :  { %2225 = shalt.err (!%p2222_p0)
}
 0x1ad   :  { %s2226_s28 = scalar_lea.hbm %s2862_s3, 4096 }
 0x1ae   :  { %p2227_p1 = scmp.ne.s32.totalorder %s2862_s3, %s2226_s28  ;;  %p2230_p2 = scmp.lt.u32.totalorder %s2226_s28, %s2862_s3 }
 0x1b0   :  { %p2232_p3 = pnand %p2230_p2, %p2227_p1 }
 0x1b2   :  { %2235 = shalt.err (!%p2232_p3)
}
 0x1b3   :  { %1478 = dma.vmem_to_hbm [thread:$0]  %s1473_s22, 4096, %s2862_s3, [#allocation4], %s2244_s24, %s2244_s24, %s2245_s25  }
 0x1b4   :  { %2240 = dma.done.wait [#allocation4], 4096  }
 0x1b5   :  { %2241 = vsyncadd [#allocation4], 4294963200 }
 0x1b6   :  { %1482 = vsyncpa [#allocation3], 1 }
 0x1b7   :  { %1483 = vsyncpa [#allocation6], 1 }
 0x1b8   :  { %1484 = vsyncpa [#allocation4], 1 }

</bundles_post_ra>
